<compile_context>
chip_gen: v6e
topology: v6e:2x2x1
jax: 0.10.0
libtpu: 0.0.40
codegen_flags: <defaults>
</compile_context>

<pallas_src>
import math

import jax
import jax.numpy as jnp
from jax.experimental import pallas as pl
from jax.experimental.pallas import tpu as pltpu

# ---------------- small config consistent with the module's forward ----------------
BATCH = 2
SEQ = 8
HIDDEN = 32          # stands in for BERT-large's 1024
NUM_HEADS = 4
HEAD_DIM = HIDDEN // NUM_HEADS
INTERMEDIATE = 64
NUM_LAYERS = 2
VOCAB = 100
MAX_POS = 16
TYPE_VOCAB = 2
NUM_LABELS = 3       # len(train_data.columns) - 1 is data-dependent; pick 3
CLS_PAD = 128        # classifier output padded to 128 lanes (lane-dense store)
SMALL_PAD = 128      # lane padding of the packed per-layer small-param block
LN_EPS = 1e-12
ATTN_SCALE = 1.0 / math.sqrt(HEAD_DIM)

# row indices inside the packed (L, 8, 128) small-param block
_BQKV, _BO, _G1, _B1, _BI, _BOUT, _G2, _B2 = range(8)


# ================================ fused Pallas kernel ================================
def _layernorm(x, gamma, beta):
    mu = jnp.mean(x, axis=-1, keepdims=True)
    var = jnp.mean(jnp.square(x - mu), axis=-1, keepdims=True)
    return (x - mu) * jax.lax.rsqrt(var + LN_EPS) * gamma + beta


def _fused_forward_kernel(
    # whole-forward inputs (all VMEM-resident for the whole kernel)
    emb_ref, mask_ref, eln_ref,
    # stacked per-layer weights (leading dim = layer)
    wqkv_ref, wo_ref, wi_ref, wout_ref, small_ref,
    # classification head
    prew_ref, preb_ref, clsw_ref, clsb_ref,
    # output
    logits_ref):
    eln = eln_ref[...]                                       # (2, H): row0 gamma, row1 beta
    x = _layernorm(emb_ref[...], eln[0:1, :], eln[1:2, :])   # (B*S, H) f32 activation carry
    add_mask = mask_ref[...]                                 # (B, 1, S) additive mask

    def layer_step(l, x):
        wqkv = wqkv_ref[l]                                   # (H, 3H) bf16
        wo = wo_ref[l]                                       # (H, H)  bf16
        wi = wi_ref[l]                                       # (H, I)  bf16
        wout = wout_ref[l]                                   # (I, H)  bf16
        sp = small_ref[l]                                    # (8, 128) f32 packed params
        bqkv = sp[_BQKV:_BQKV + 1, :3 * HIDDEN]
        bo = sp[_BO:_BO + 1, :HIDDEN]
        g1 = sp[_G1:_G1 + 1, :HIDDEN]
        b1 = sp[_B1:_B1 + 1, :HIDDEN]
        bi = sp[_BI:_BI + 1, :INTERMEDIATE]
        bout = sp[_BOUT:_BOUT + 1, :HIDDEN]
        g2 = sp[_G2:_G2 + 1, :HIDDEN]
        b2 = sp[_B2:_B2 + 1, :HIDDEN]

        # ---- fused QKV projection: one matmul per layer (bf16 MXU, f32 acc) ----
        qkv = jnp.dot(x.astype(jnp.bfloat16), wqkv,
                      preferred_element_type=jnp.float32) + bqkv       # (B*S, 3H) f32

        # ---- multi-head self attention: batch-dim einsums, heads unrolled ----
        ctx_heads = []
        for h in range(NUM_HEADS):
            q = qkv[:, h * HEAD_DIM:(h + 1) * HEAD_DIM].reshape(BATCH, SEQ, HEAD_DIM)
            k = qkv[:, HIDDEN + h * HEAD_DIM:
                       HIDDEN + (h + 1) * HEAD_DIM].reshape(BATCH, SEQ, HEAD_DIM)
            v = qkv[:, 2 * HIDDEN + h * HEAD_DIM:
                       2 * HIDDEN + (h + 1) * HEAD_DIM].reshape(BATCH, SEQ, HEAD_DIM)
            s = jnp.einsum('bqd,bkd->bqk', q, k,
                           preferred_element_type=jnp.float32) * ATTN_SCALE + add_mask
            e = jnp.exp(s - jnp.max(s, axis=-1, keepdims=True))
            p = e * pl.reciprocal(jnp.sum(e, axis=-1, keepdims=True), approx=True)
            ctx_heads.append(jnp.einsum('bqk,bkd->bqd', p, v,
                                        preferred_element_type=jnp.float32))
        ctx = jnp.concatenate(ctx_heads, axis=-1).reshape(BATCH * SEQ, HIDDEN)

        # ---- output proj + residual + LN (fused) ----
        attn = jnp.dot(ctx.astype(jnp.bfloat16), wo,
                       preferred_element_type=jnp.float32) + bo
        x1 = _layernorm(attn + x, g1, b1)

        # ---- FFN + residual + LN (fused) ----
        # TODO(synk): HF BERT uses exact (erf) GELU; tanh approximation used here.
        hmid = jax.nn.gelu(jnp.dot(x1.astype(jnp.bfloat16), wi,
                                   preferred_element_type=jnp.float32) + bi,
                           approximate=True)
        ffn = jnp.dot(hmid.astype(jnp.bfloat16), wout,
                      preferred_element_type=jnp.float32) + bout
        return _layernorm(ffn + x1, g2, b2)

    # Statically unrolled layer loop (NUM_LAYERS=2): weight indexing is static and the
    # activation never leaves VMEM. For deep stacks, switch to lax.fori_loop(unroll=...)
    # or reintroduce a layer grid axis with tiled weight BlockSpecs.
    for l in range(NUM_LAYERS):
        x = layer_step(l, x)

    # ---- classification head on the [CLS] row of every sequence ----
    cls = x.reshape(BATCH, SEQ, HIDDEN)[:, 0, :]                        # (B, H)
    h1 = jnp.dot(cls.astype(jnp.bfloat16), prew_ref[...],
                 preferred_element_type=jnp.float32) + preb_ref[...]
    h1 = jnp.maximum(h1, 0.0)            # ReLU; dropout(0.3) is identity at eval
    logits_ref[...] = jnp.dot(h1.astype(jnp.bfloat16), clsw_ref[...],
                              preferred_element_type=jnp.float32) + clsb_ref[...]


def fused_forward(emb, add_mask, p):
    vmem = lambda: pl.BlockSpec(memory_space=pltpu.MemorySpace.VMEM)
    # At real BERT-large scale: store weights bf16 (done), raise vmem_limit_bytes,
    # tile INTERMEDIATE on a grid axis, and add a parallel batch axis for v7x's 2nd TC.
    return pl.pallas_call(
        _fused_forward_kernel,
        out_shape=jax.ShapeDtypeStruct((BATCH, CLS_PAD), jnp.float32),
        in_specs=[vmem() for _ in range(12)],
        out_specs=vmem(),
    )(emb, add_mask, p["emb_ln"],
      p["wqkv"], p["wo"], p["wi"], p["wout"], p["small"],
      p["pre_w"], p["pre_b"], p["cls_w_pad"], p["cls_b_pad"])


# ================================ parameter init ================================
def _dense_bf16(key, fan_in, fan_out):
    return (jax.random.normal(key, (fan_in, fan_out), jnp.float32) * 0.02).astype(jnp.bfloat16)


def init_params(key):
    keys = jax.random.split(key, 8 + NUM_LAYERS)
    cls_w = jax.random.normal(keys[4], (HIDDEN, NUM_LABELS), jnp.float32) * 0.02
    cls_w_pad = jnp.zeros((HIDDEN, CLS_PAD), jnp.float32).at[:, :NUM_LABELS].set(cls_w)
    params = {
        "word_emb": jax.random.normal(keys[0], (VOCAB, HIDDEN), jnp.float32) * 0.02,
        "pos_emb": jax.random.normal(keys[1], (MAX_POS, HIDDEN), jnp.float32) * 0.02,
        "type_emb": jax.random.normal(keys[2], (TYPE_VOCAB, HIDDEN), jnp.float32) * 0.02,
        "emb_ln": jnp.concatenate([jnp.ones((1, HIDDEN), jnp.float32),
                                   jnp.zeros((1, HIDDEN), jnp.float32)], axis=0),
        "pre_w": _dense_bf16(keys[3], HIDDEN, HIDDEN),
        "pre_b": jnp.zeros((1, HIDDEN), jnp.float32),
        "cls_w_pad": cls_w_pad.astype(jnp.bfloat16),
        "cls_b_pad": jnp.zeros((1, CLS_PAD), jnp.float32),
    }
    wqkv, wo, wi, wout, small = [], [], [], [], []
    for li in range(NUM_LAYERS):
        lk = jax.random.split(keys[8 + li], 6)
        wq = jax.random.normal(lk[0], (HIDDEN, HIDDEN), jnp.float32) * 0.02
        wk = jax.random.normal(lk[1], (HIDDEN, HIDDEN), jnp.float32) * 0.02
        wv = jax.random.normal(lk[2], (HIDDEN, HIDDEN), jnp.float32) * 0.02
        wqkv.append(jnp.concatenate([wq, wk, wv], axis=1).astype(jnp.bfloat16))   # (H, 3H)
        wo.append(_dense_bf16(lk[3], HIDDEN, HIDDEN))
        wi.append(_dense_bf16(lk[4], HIDDEN, INTERMEDIATE))
        wout.append(_dense_bf16(lk[5], INTERMEDIATE, HIDDEN))
        # packed per-layer small params: biases zero, LN gammas one (BERT default init)
        blk = jnp.zeros((8, SMALL_PAD), jnp.float32)
        blk = blk.at[_G1, :HIDDEN].set(1.0).at[_G2, :HIDDEN].set(1.0)
        small.append(blk)
    params.update({
        "wqkv": jnp.stack(wqkv), "wo": jnp.stack(wo),
        "wi": jnp.stack(wi), "wout": jnp.stack(wout),
        "small": jnp.stack(small),
    })
    return params


# ================================ forward pass ================================
def roberta_class_forward(params, input_ids, attention_mask, token_type_ids):
    B, S = input_ids.shape
    # TODO(synk): embedding gathers are data-dependent (no clean BlockSpec) and stay in
    # plain JAX; real RoBERTa offsets position ids by padding_idx+1 (simplified to arange).
    emb = (params["word_emb"][input_ids]
           + params["pos_emb"][jnp.arange(S)][None, :, :]
           + params["type_emb"][token_type_ids]).reshape(B * S, HIDDEN)
    # BERT-style additive attention mask, precomputed once, broadcastable over (B, Sq, Sk)
    add_mask = ((1.0 - attention_mask.astype(jnp.float32)) * -10000.0)[:, None, :]  # (B,1,S)
    logits_pad = fused_forward(emb, add_mask, params)
    return logits_pad[:, :NUM_LABELS]


# ================================ driver ================================
if __name__ == "__main__":
    key = jax.random.PRNGKey(0)
    pkey, ikey = jax.random.split(key)
    params = init_params(pkey)

    input_ids = jax.random.randint(ikey, (BATCH, SEQ), 0, VOCAB, dtype=jnp.int32)
    attention_mask = jnp.ones((BATCH, SEQ), dtype=jnp.int32).at[1, SEQ - 2:].set(0)
    token_type_ids = jnp.zeros((BATCH, SEQ), dtype=jnp.int32)

    fwd = jax.jit(roberta_class_forward)
    logits = fwd(params, input_ids, attention_mask, token_type_ids)
    jax.block_until_ready(logits)
    assert logits.shape == (BATCH, NUM_LABELS)
    print("KERNEL_OK")
</pallas_src>

<mosaic_0001>
module attributes {stable_mosaic.version = 11 : i64} {
  func.func @_fused_forward_kernel(%arg0: memref<16x32xf32, #tpu.memory_space<vmem>>, %arg1: memref<2x1x8xf32, #tpu.memory_space<vmem>>, %arg2: memref<2x32xf32, #tpu.memory_space<vmem>>, %arg3: memref<2x32x96xbf16, #tpu.memory_space<vmem>>, %arg4: memref<2x32x32xbf16, #tpu.memory_space<vmem>>, %arg5: memref<2x32x64xbf16, #tpu.memory_space<vmem>>, %arg6: memref<2x64x32xbf16, #tpu.memory_space<vmem>>, %arg7: memref<2x8x128xf32, #tpu.memory_space<vmem>>, %arg8: memref<32x32xbf16, #tpu.memory_space<vmem>>, %arg9: memref<1x32xf32, #tpu.memory_space<vmem>>, %arg10: memref<32x128xbf16, #tpu.memory_space<vmem>>, %arg11: memref<1x128xf32, #tpu.memory_space<vmem>>, %arg12: memref<2x128xf32, #tpu.memory_space<vmem>>) attributes {dimension_semantics = [], scalar_prefetch = 0 : i64, scratch_operands = 0 : i64, tpu.core_type = #tpu.core_type<tc>} {
    %c0 = arith.constant 0 : index
    %c0_0 = arith.constant 0 : index
    %0 = vector.load %arg2[%c0, %c0_0] : memref<2x32xf32, #tpu.memory_space<vmem>>, vector<2x32xf32>
    %c0_1 = arith.constant 0 : index
    %c0_2 = arith.constant 0 : index
    %1 = vector.load %arg0[%c0_1, %c0_2] : memref<16x32xf32, #tpu.memory_space<vmem>>, vector<16x32xf32>
    %2 = vector.extract_strided_slice %0 {offsets = [0, 0], sizes = [1, 32], strides = [1, 1]} : vector<2x32xf32> to vector<1x32xf32>
    %3 = vector.extract_strided_slice %0 {offsets = [1, 0], sizes = [1, 32], strides = [1, 1]} : vector<2x32xf32> to vector<1x32xf32>
    %cst = arith.constant dense<0.000000e+00> : vector<16xf32>
    %4 = vector.multi_reduction <add>, %1, %cst [1] : vector<16x32xf32> to vector<16xf32>
    %5 = vector.shape_cast %4 : vector<16xf32> to vector<16x1xf32>
    %cst_3 = arith.constant 3.200000e+01 : f32
    %6 = vector.broadcast %cst_3 : f32 to vector<16x1xf32>
    %7 = arith.divf %5, %6 : vector<16x1xf32>
    %8 = vector.broadcast %7 : vector<16x1xf32> to vector<16x32xf32>
    %9 = arith.subf %1, %8 : vector<16x32xf32>
    %10 = arith.mulf %9, %9 : vector<16x32xf32>
    %cst_4 = arith.constant dense<0.000000e+00> : vector<16xf32>
    %11 = vector.multi_reduction <add>, %10, %cst_4 [1] : vector<16x32xf32> to vector<16xf32>
    %12 = vector.shape_cast %11 : vector<16xf32> to vector<16x1xf32>
    %cst_5 = arith.constant 3.200000e+01 : f32
    %13 = vector.broadcast %cst_5 : f32 to vector<16x1xf32>
    %14 = arith.divf %12, %13 : vector<16x1xf32>
    %15 = vector.broadcast %7 : vector<16x1xf32> to vector<16x32xf32>
    %16 = arith.subf %1, %15 : vector<16x32xf32>
    %cst_6 = arith.constant 9.99999996E-13 : f32
    %17 = vector.broadcast %cst_6 : f32 to vector<16x1xf32>
    %18 = arith.addf %14, %17 : vector<16x1xf32>
    %19 = math.rsqrt %18 : vector<16x1xf32>
    %20 = vector.broadcast %19 : vector<16x1xf32> to vector<16x32xf32>
    %21 = arith.mulf %16, %20 : vector<16x32xf32>
    %22 = vector.broadcast %2 : vector<1x32xf32> to vector<16x32xf32>
    %23 = arith.mulf %21, %22 : vector<16x32xf32>
    %24 = vector.broadcast %3 : vector<1x32xf32> to vector<16x32xf32>
    %25 = arith.addf %23, %24 : vector<16x32xf32>
    %c0_7 = arith.constant 0 : index
    %c0_8 = arith.constant 0 : index
    %c0_9 = arith.constant 0 : index
    %26 = vector.load %arg1[%c0_7, %c0_8, %c0_9] : memref<2x1x8xf32, #tpu.memory_space<vmem>>, vector<2x1x8xf32>
    %c0_10 = arith.constant 0 : index
    %c0_11 = arith.constant 0 : index
    %c0_12 = arith.constant 0 : index
    %27 = vector.load %arg3[%c0_10, %c0_11, %c0_12] : memref<2x32x96xbf16, #tpu.memory_space<vmem>>, vector<1x32x96xbf16>
    %28 = vector.shape_cast %27 : vector<1x32x96xbf16> to vector<32x96xbf16>
    %c0_13 = arith.constant 0 : index
    %c0_14 = arith.constant 0 : index
    %c0_15 = arith.constant 0 : index
    %29 = vector.load %arg4[%c0_13, %c0_14, %c0_15] : memref<2x32x32xbf16, #tpu.memory_space<vmem>>, vector<1x32x32xbf16>
    %30 = vector.shape_cast %29 : vector<1x32x32xbf16> to vector<32x32xbf16>
    %c0_16 = arith.constant 0 : index
    %c0_17 = arith.constant 0 : index
    %c0_18 = arith.constant 0 : index
    %31 = vector.load %arg5[%c0_16, %c0_17, %c0_18] : memref<2x32x64xbf16, #tpu.memory_space<vmem>>, vector<1x32x64xbf16>
    %32 = vector.shape_cast %31 : vector<1x32x64xbf16> to vector<32x64xbf16>
    %c0_19 = arith.constant 0 : index
    %c0_20 = arith.constant 0 : index
    %c0_21 = arith.constant 0 : index
    %33 = vector.load %arg6[%c0_19, %c0_20, %c0_21] : memref<2x64x32xbf16, #tpu.memory_space<vmem>>, vector<1x64x32xbf16>
    %34 = vector.shape_cast %33 : vector<1x64x32xbf16> to vector<64x32xbf16>
    %c0_22 = arith.constant 0 : index
    %c0_23 = arith.constant 0 : index
    %c0_24 = arith.constant 0 : index
    %35 = vector.load %arg7[%c0_22, %c0_23, %c0_24] : memref<2x8x128xf32, #tpu.memory_space<vmem>>, vector<1x8x128xf32>
    %36 = vector.shape_cast %35 : vector<1x8x128xf32> to vector<8x128xf32>
    %37 = vector.extract_strided_slice %36 {offsets = [0, 0], sizes = [1, 96], strides = [1, 1]} : vector<8x128xf32> to vector<1x96xf32>
    %38 = vector.extract_strided_slice %36 {offsets = [1, 0], sizes = [1, 32], strides = [1, 1]} : vector<8x128xf32> to vector<1x32xf32>
    %39 = vector.extract_strided_slice %36 {offsets = [2, 0], sizes = [1, 32], strides = [1, 1]} : vector<8x128xf32> to vector<1x32xf32>
    %40 = vector.extract_strided_slice %36 {offsets = [3, 0], sizes = [1, 32], strides = [1, 1]} : vector<8x128xf32> to vector<1x32xf32>
    %41 = vector.extract_strided_slice %36 {offsets = [4, 0], sizes = [1, 64], strides = [1, 1]} : vector<8x128xf32> to vector<1x64xf32>
    %42 = vector.extract_strided_slice %36 {offsets = [5, 0], sizes = [1, 32], strides = [1, 1]} : vector<8x128xf32> to vector<1x32xf32>
    %43 = vector.extract_strided_slice %36 {offsets = [6, 0], sizes = [1, 32], strides = [1, 1]} : vector<8x128xf32> to vector<1x32xf32>
    %44 = vector.extract_strided_slice %36 {offsets = [7, 0], sizes = [1, 32], strides = [1, 1]} : vector<8x128xf32> to vector<1x32xf32>
    %45 = arith.truncf %25 : vector<16x32xf32> to vector<16x32xbf16>
    %cst_25 = arith.constant dense<0.000000e+00> : vector<16x96xf32>
    %46 = tpu.matmul %45, %28, %cst_25 {dimension_numbers = #tpu.dot_dimension_numbers<[1], [0], [0], [1], [0, 0, 1, 1], [], []>} : vector<16x32xbf16>, vector<32x96xbf16>, vector<16x96xf32> -> vector<16x96xf32>
    %47 = vector.broadcast %37 : vector<1x96xf32> to vector<16x96xf32>
    %48 = arith.addf %46, %47 : vector<16x96xf32>
    %49 = vector.extract_strided_slice %48 {offsets = [0, 0], sizes = [16, 8], strides = [1, 1]} : vector<16x96xf32> to vector<16x8xf32>
    %50 = vector.shape_cast %49 : vector<16x8xf32> to vector<2x8x8xf32>
    %51 = vector.extract_strided_slice %48 {offsets = [0, 32], sizes = [16, 8], strides = [1, 1]} : vector<16x96xf32> to vector<16x8xf32>
    %52 = vector.shape_cast %51 : vector<16x8xf32> to vector<2x8x8xf32>
    %53 = vector.extract_strided_slice %48 {offsets = [0, 64], sizes = [16, 8], strides = [1, 1]} : vector<16x96xf32> to vector<16x8xf32>
    %54 = vector.shape_cast %53 : vector<16x8xf32> to vector<2x8x8xf32>
    "tpu.trace_start"() <{level = 10 : i32, message = "bqd,bkd->bqk"}> : () -> ()
    %cst_26 = arith.constant dense<0.000000e+00> : vector<2x8x8xf32>
    %55 = tpu.matmul %50, %52, %cst_26 {dimension_numbers = #tpu.dot_dimension_numbers<[2], [2], [1], [1], [0, 0, 0, 1, 1, 1], [0], [0]>} : vector<2x8x8xf32>, vector<2x8x8xf32>, vector<2x8x8xf32> -> vector<2x8x8xf32>
    "tpu.trace_stop"() : () -> ()
    %cst_27 = arith.constant 0.353553385 : f32
    %56 = vector.broadcast %cst_27 : f32 to vector<2x8x8xf32>
    %57 = arith.mulf %55, %56 : vector<2x8x8xf32>
    %58 = vector.broadcast %26 : vector<2x1x8xf32> to vector<2x8x8xf32>
    %59 = arith.addf %57, %58 : vector<2x8x8xf32>
    %cst_28 = arith.constant dense<0xFF800000> : vector<2x8xf32>
    %60 = vector.multi_reduction <maximumf>, %59, %cst_28 [2] : vector<2x8x8xf32> to vector<2x8xf32>
    %61 = vector.shape_cast %60 : vector<2x8xf32> to vector<2x8x1xf32>
    %62 = vector.broadcast %61 : vector<2x8x1xf32> to vector<2x8x8xf32>
    %63 = arith.subf %59, %62 : vector<2x8x8xf32>
    %64 = math.exp %63 : vector<2x8x8xf32>
    %cst_29 = arith.constant dense<0.000000e+00> : vector<2x8xf32>
    %65 = vector.multi_reduction <add>, %64, %cst_29 [2] : vector<2x8x8xf32> to vector<2x8xf32>
    %66 = vector.shape_cast %65 : vector<2x8xf32> to vector<2x8x1xf32>
    %67 = tpu.reciprocal %66 {approx = true} : vector<2x8x1xf32> -> vector<2x8x1xf32>
    %68 = vector.broadcast %67 : vector<2x8x1xf32> to vector<2x8x8xf32>
    %69 = arith.mulf %64, %68 : vector<2x8x8xf32>
    "tpu.trace_start"() <{level = 10 : i32, message = "bqk,bkd->bqd"}> : () -> ()
    %cst_30 = arith.constant dense<0.000000e+00> : vector<2x8x8xf32>
    %70 = tpu.matmul %69, %54, %cst_30 {dimension_numbers = #tpu.dot_dimension_numbers<[2], [1], [1], [2], [0, 0, 0, 1, 1, 2], [0], [0]>} : vector<2x8x8xf32>, vector<2x8x8xf32>, vector<2x8x8xf32> -> vector<2x8x8xf32>
    "tpu.trace_stop"() : () -> ()
    %71 = vector.extract_strided_slice %48 {offsets = [0, 8], sizes = [16, 8], strides = [1, 1]} : vector<16x96xf32> to vector<16x8xf32>
    %72 = vector.shape_cast %71 : vector<16x8xf32> to vector<2x8x8xf32>
    %73 = vector.extract_strided_slice %48 {offsets = [0, 40], sizes = [16, 8], strides = [1, 1]} : vector<16x96xf32> to vector<16x8xf32>
    %74 = vector.shape_cast %73 : vector<16x8xf32> to vector<2x8x8xf32>
    %75 = vector.extract_strided_slice %48 {offsets = [0, 72], sizes = [16, 8], strides = [1, 1]} : vector<16x96xf32> to vector<16x8xf32>
    %76 = vector.shape_cast %75 : vector<16x8xf32> to vector<2x8x8xf32>
    "tpu.trace_start"() <{level = 10 : i32, message = "bqd,bkd->bqk"}> : () -> ()
    %cst_31 = arith.constant dense<0.000000e+00> : vector<2x8x8xf32>
    %77 = tpu.matmul %72, %74, %cst_31 {dimension_numbers = #tpu.dot_dimension_numbers<[2], [2], [1], [1], [0, 0, 0, 1, 1, 1], [0], [0]>} : vector<2x8x8xf32>, vector<2x8x8xf32>, vector<2x8x8xf32> -> vector<2x8x8xf32>
    "tpu.trace_stop"() : () -> ()
    %cst_32 = arith.constant 0.353553385 : f32
    %78 = vector.broadcast %cst_32 : f32 to vector<2x8x8xf32>
    %79 = arith.mulf %77, %78 : vector<2x8x8xf32>
    %80 = vector.broadcast %26 : vector<2x1x8xf32> to vector<2x8x8xf32>
    %81 = arith.addf %79, %80 : vector<2x8x8xf32>
    %cst_33 = arith.constant dense<0xFF800000> : vector<2x8xf32>
    %82 = vector.multi_reduction <maximumf>, %81, %cst_33 [2] : vector<2x8x8xf32> to vector<2x8xf32>
    %83 = vector.shape_cast %82 : vector<2x8xf32> to vector<2x8x1xf32>
    %84 = vector.broadcast %83 : vector<2x8x1xf32> to vector<2x8x8xf32>
    %85 = arith.subf %81, %84 : vector<2x8x8xf32>
    %86 = math.exp %85 : vector<2x8x8xf32>
    %cst_34 = arith.constant dense<0.000000e+00> : vector<2x8xf32>
    %87 = vector.multi_reduction <add>, %86, %cst_34 [2] : vector<2x8x8xf32> to vector<2x8xf32>
    %88 = vector.shape_cast %87 : vector<2x8xf32> to vector<2x8x1xf32>
    %89 = tpu.reciprocal %88 {approx = true} : vector<2x8x1xf32> -> vector<2x8x1xf32>
    %90 = vector.broadcast %89 : vector<2x8x1xf32> to vector<2x8x8xf32>
    %91 = arith.mulf %86, %90 : vector<2x8x8xf32>
    "tpu.trace_start"() <{level = 10 : i32, message = "bqk,bkd->bqd"}> : () -> ()
    %cst_35 = arith.constant dense<0.000000e+00> : vector<2x8x8xf32>
    %92 = tpu.matmul %91, %76, %cst_35 {dimension_numbers = #tpu.dot_dimension_numbers<[2], [1], [1], [2], [0, 0, 0, 1, 1, 2], [0], [0]>} : vector<2x8x8xf32>, vector<2x8x8xf32>, vector<2x8x8xf32> -> vector<2x8x8xf32>
    "tpu.trace_stop"() : () -> ()
    %93 = vector.extract_strided_slice %48 {offsets = [0, 16], sizes = [16, 8], strides = [1, 1]} : vector<16x96xf32> to vector<16x8xf32>
    %94 = vector.shape_cast %93 : vector<16x8xf32> to vector<2x8x8xf32>
    %95 = vector.extract_strided_slice %48 {offsets = [0, 48], sizes = [16, 8], strides = [1, 1]} : vector<16x96xf32> to vector<16x8xf32>
    %96 = vector.shape_cast %95 : vector<16x8xf32> to vector<2x8x8xf32>
    %97 = vector.extract_strided_slice %48 {offsets = [0, 80], sizes = [16, 8], strides = [1, 1]} : vector<16x96xf32> to vector<16x8xf32>
    %98 = vector.shape_cast %97 : vector<16x8xf32> to vector<2x8x8xf32>
    "tpu.trace_start"() <{level = 10 : i32, message = "bqd,bkd->bqk"}> : () -> ()
    %cst_36 = arith.constant dense<0.000000e+00> : vector<2x8x8xf32>
    %99 = tpu.matmul %94, %96, %cst_36 {dimension_numbers = #tpu.dot_dimension_numbers<[2], [2], [1], [1], [0, 0, 0, 1, 1, 1], [0], [0]>} : vector<2x8x8xf32>, vector<2x8x8xf32>, vector<2x8x8xf32> -> vector<2x8x8xf32>
    "tpu.trace_stop"() : () -> ()
    %cst_37 = arith.constant 0.353553385 : f32
    %100 = vector.broadcast %cst_37 : f32 to vector<2x8x8xf32>
    %101 = arith.mulf %99, %100 : vector<2x8x8xf32>
    %102 = vector.broadcast %26 : vector<2x1x8xf32> to vector<2x8x8xf32>
    %103 = arith.addf %101, %102 : vector<2x8x8xf32>
    %cst_38 = arith.constant dense<0xFF800000> : vector<2x8xf32>
    %104 = vector.multi_reduction <maximumf>, %103, %cst_38 [2] : vector<2x8x8xf32> to vector<2x8xf32>
    %105 = vector.shape_cast %104 : vector<2x8xf32> to vector<2x8x1xf32>
    %106 = vector.broadcast %105 : vector<2x8x1xf32> to vector<2x8x8xf32>
    %107 = arith.subf %103, %106 : vector<2x8x8xf32>
    %108 = math.exp %107 : vector<2x8x8xf32>
    %cst_39 = arith.constant dense<0.000000e+00> : vector<2x8xf32>
    %109 = vector.multi_reduction <add>, %108, %cst_39 [2] : vector<2x8x8xf32> to vector<2x8xf32>
    %110 = vector.shape_cast %109 : vector<2x8xf32> to vector<2x8x1xf32>
    %111 = tpu.reciprocal %110 {approx = true} : vector<2x8x1xf32> -> vector<2x8x1xf32>
    %112 = vector.broadcast %111 : vector<2x8x1xf32> to vector<2x8x8xf32>
    %113 = arith.mulf %108, %112 : vector<2x8x8xf32>
    "tpu.trace_start"() <{level = 10 : i32, message = "bqk,bkd->bqd"}> : () -> ()
    %cst_40 = arith.constant dense<0.000000e+00> : vector<2x8x8xf32>
    %114 = tpu.matmul %113, %98, %cst_40 {dimension_numbers = #tpu.dot_dimension_numbers<[2], [1], [1], [2], [0, 0, 0, 1, 1, 2], [0], [0]>} : vector<2x8x8xf32>, vector<2x8x8xf32>, vector<2x8x8xf32> -> vector<2x8x8xf32>
    "tpu.trace_stop"() : () -> ()
    %115 = vector.extract_strided_slice %48 {offsets = [0, 24], sizes = [16, 8], strides = [1, 1]} : vector<16x96xf32> to vector<16x8xf32>
    %116 = vector.shape_cast %115 : vector<16x8xf32> to vector<2x8x8xf32>
    %117 = vector.extract_strided_slice %48 {offsets = [0, 56], sizes = [16, 8], strides = [1, 1]} : vector<16x96xf32> to vector<16x8xf32>
    %118 = vector.shape_cast %117 : vector<16x8xf32> to vector<2x8x8xf32>
    %119 = vector.extract_strided_slice %48 {offsets = [0, 88], sizes = [16, 8], strides = [1, 1]} : vector<16x96xf32> to vector<16x8xf32>
    %120 = vector.shape_cast %119 : vector<16x8xf32> to vector<2x8x8xf32>
    "tpu.trace_start"() <{level = 10 : i32, message = "bqd,bkd->bqk"}> : () -> ()
    %cst_41 = arith.constant dense<0.000000e+00> : vector<2x8x8xf32>
    %121 = tpu.matmul %116, %118, %cst_41 {dimension_numbers = #tpu.dot_dimension_numbers<[2], [2], [1], [1], [0, 0, 0, 1, 1, 1], [0], [0]>} : vector<2x8x8xf32>, vector<2x8x8xf32>, vector<2x8x8xf32> -> vector<2x8x8xf32>
    "tpu.trace_stop"() : () -> ()
    %cst_42 = arith.constant 0.353553385 : f32
    %122 = vector.broadcast %cst_42 : f32 to vector<2x8x8xf32>
    %123 = arith.mulf %121, %122 : vector<2x8x8xf32>
    %124 = vector.broadcast %26 : vector<2x1x8xf32> to vector<2x8x8xf32>
    %125 = arith.addf %123, %124 : vector<2x8x8xf32>
    %cst_43 = arith.constant dense<0xFF800000> : vector<2x8xf32>
    %126 = vector.multi_reduction <maximumf>, %125, %cst_43 [2] : vector<2x8x8xf32> to vector<2x8xf32>
    %127 = vector.shape_cast %126 : vector<2x8xf32> to vector<2x8x1xf32>
    %128 = vector.broadcast %127 : vector<2x8x1xf32> to vector<2x8x8xf32>
    %129 = arith.subf %125, %128 : vector<2x8x8xf32>
    %130 = math.exp %129 : vector<2x8x8xf32>
    %cst_44 = arith.constant dense<0.000000e+00> : vector<2x8xf32>
    %131 = vector.multi_reduction <add>, %130, %cst_44 [2] : vector<2x8x8xf32> to vector<2x8xf32>
    %132 = vector.shape_cast %131 : vector<2x8xf32> to vector<2x8x1xf32>
    %133 = tpu.reciprocal %132 {approx = true} : vector<2x8x1xf32> -> vector<2x8x1xf32>
    %134 = vector.broadcast %133 : vector<2x8x1xf32> to vector<2x8x8xf32>
    %135 = arith.mulf %130, %134 : vector<2x8x8xf32>
    "tpu.trace_start"() <{level = 10 : i32, message = "bqk,bkd->bqd"}> : () -> ()
    %cst_45 = arith.constant dense<0.000000e+00> : vector<2x8x8xf32>
    %136 = tpu.matmul %135, %120, %cst_45 {dimension_numbers = #tpu.dot_dimension_numbers<[2], [1], [1], [2], [0, 0, 0, 1, 1, 2], [0], [0]>} : vector<2x8x8xf32>, vector<2x8x8xf32>, vector<2x8x8xf32> -> vector<2x8x8xf32>
    "tpu.trace_stop"() : () -> ()
    %137 = tpu.concatenate %70, %92, %114, %136 in 2 : vector<2x8x8xf32>, vector<2x8x8xf32>, vector<2x8x8xf32>, vector<2x8x8xf32> -> vector<2x8x32xf32>
    %138 = vector.shape_cast %137 : vector<2x8x32xf32> to vector<16x32xf32>
    %139 = arith.truncf %138 : vector<16x32xf32> to vector<16x32xbf16>
    %cst_46 = arith.constant dense<0.000000e+00> : vector<16x32xf32>
    %140 = tpu.matmul %139, %30, %cst_46 {dimension_numbers = #tpu.dot_dimension_numbers<[1], [0], [0], [1], [0, 0, 1, 1], [], []>} : vector<16x32xbf16>, vector<32x32xbf16>, vector<16x32xf32> -> vector<16x32xf32>
    %141 = vector.broadcast %38 : vector<1x32xf32> to vector<16x32xf32>
    %142 = arith.addf %140, %141 : vector<16x32xf32>
    %143 = arith.addf %142, %25 : vector<16x32xf32>
    %cst_47 = arith.constant dense<0.000000e+00> : vector<16xf32>
    %144 = vector.multi_reduction <add>, %143, %cst_47 [1] : vector<16x32xf32> to vector<16xf32>
    %145 = vector.shape_cast %144 : vector<16xf32> to vector<16x1xf32>
    %cst_48 = arith.constant 3.200000e+01 : f32
    %146 = vector.broadcast %cst_48 : f32 to vector<16x1xf32>
    %147 = arith.divf %145, %146 : vector<16x1xf32>
    %148 = vector.broadcast %147 : vector<16x1xf32> to vector<16x32xf32>
    %149 = arith.subf %143, %148 : vector<16x32xf32>
    %150 = arith.mulf %149, %149 : vector<16x32xf32>
    %cst_49 = arith.constant dense<0.000000e+00> : vector<16xf32>
    %151 = vector.multi_reduction <add>, %150, %cst_49 [1] : vector<16x32xf32> to vector<16xf32>
    %152 = vector.shape_cast %151 : vector<16xf32> to vector<16x1xf32>
    %cst_50 = arith.constant 3.200000e+01 : f32
    %153 = vector.broadcast %cst_50 : f32 to vector<16x1xf32>
    %154 = arith.divf %152, %153 : vector<16x1xf32>
    %155 = vector.broadcast %147 : vector<16x1xf32> to vector<16x32xf32>
    %156 = arith.subf %143, %155 : vector<16x32xf32>
    %cst_51 = arith.constant 9.99999996E-13 : f32
    %157 = vector.broadcast %cst_51 : f32 to vector<16x1xf32>
    %158 = arith.addf %154, %157 : vector<16x1xf32>
    %159 = math.rsqrt %158 : vector<16x1xf32>
    %160 = vector.broadcast %159 : vector<16x1xf32> to vector<16x32xf32>
    %161 = arith.mulf %156, %160 : vector<16x32xf32>
    %162 = vector.broadcast %39 : vector<1x32xf32> to vector<16x32xf32>
    %163 = arith.mulf %161, %162 : vector<16x32xf32>
    %164 = vector.broadcast %40 : vector<1x32xf32> to vector<16x32xf32>
    %165 = arith.addf %163, %164 : vector<16x32xf32>
    %166 = arith.truncf %165 : vector<16x32xf32> to vector<16x32xbf16>
    %cst_52 = arith.constant dense<0.000000e+00> : vector<16x64xf32>
    %167 = tpu.matmul %166, %32, %cst_52 {dimension_numbers = #tpu.dot_dimension_numbers<[1], [0], [0], [1], [0, 0, 1, 1], [], []>} : vector<16x32xbf16>, vector<32x64xbf16>, vector<16x64xf32> -> vector<16x64xf32>
    %168 = vector.broadcast %41 : vector<1x64xf32> to vector<16x64xf32>
    %169 = arith.addf %167, %168 : vector<16x64xf32>
    %170 = arith.mulf %169, %169 : vector<16x64xf32>
    %171 = arith.mulf %169, %170 : vector<16x64xf32>
    %cst_53 = arith.constant 4.471500e-02 : f32
    %172 = vector.broadcast %cst_53 : f32 to vector<16x64xf32>
    %173 = arith.mulf %172, %171 : vector<16x64xf32>
    %174 = arith.addf %169, %173 : vector<16x64xf32>
    %cst_54 = arith.constant 0.797884583 : f32
    %175 = vector.broadcast %cst_54 : f32 to vector<16x64xf32>
    %176 = arith.mulf %175, %174 : vector<16x64xf32>
    %177 = math.tanh %176 : vector<16x64xf32>
    %cst_55 = arith.constant 1.000000e+00 : f32
    %178 = vector.broadcast %cst_55 : f32 to vector<16x64xf32>
    %179 = arith.addf %178, %177 : vector<16x64xf32>
    %cst_56 = arith.constant 5.000000e-01 : f32
    %180 = vector.broadcast %cst_56 : f32 to vector<16x64xf32>
    %181 = arith.mulf %180, %179 : vector<16x64xf32>
    %182 = arith.mulf %169, %181 : vector<16x64xf32>
    %183 = arith.truncf %182 : vector<16x64xf32> to vector<16x64xbf16>
    %cst_57 = arith.constant dense<0.000000e+00> : vector<16x32xf32>
    %184 = tpu.matmul %183, %34, %cst_57 {dimension_numbers = #tpu.dot_dimension_numbers<[1], [0], [0], [1], [0, 0, 1, 1], [], []>} : vector<16x64xbf16>, vector<64x32xbf16>, vector<16x32xf32> -> vector<16x32xf32>
    %185 = vector.broadcast %42 : vector<1x32xf32> to vector<16x32xf32>
    %186 = arith.addf %184, %185 : vector<16x32xf32>
    %187 = arith.addf %186, %165 : vector<16x32xf32>
    %cst_58 = arith.constant dense<0.000000e+00> : vector<16xf32>
    %188 = vector.multi_reduction <add>, %187, %cst_58 [1] : vector<16x32xf32> to vector<16xf32>
    %189 = vector.shape_cast %188 : vector<16xf32> to vector<16x1xf32>
    %cst_59 = arith.constant 3.200000e+01 : f32
    %190 = vector.broadcast %cst_59 : f32 to vector<16x1xf32>
    %191 = arith.divf %189, %190 : vector<16x1xf32>
    %192 = vector.broadcast %191 : vector<16x1xf32> to vector<16x32xf32>
    %193 = arith.subf %187, %192 : vector<16x32xf32>
    %194 = arith.mulf %193, %193 : vector<16x32xf32>
    %cst_60 = arith.constant dense<0.000000e+00> : vector<16xf32>
    %195 = vector.multi_reduction <add>, %194, %cst_60 [1] : vector<16x32xf32> to vector<16xf32>
    %196 = vector.shape_cast %195 : vector<16xf32> to vector<16x1xf32>
    %cst_61 = arith.constant 3.200000e+01 : f32
    %197 = vector.broadcast %cst_61 : f32 to vector<16x1xf32>
    %198 = arith.divf %196, %197 : vector<16x1xf32>
    %199 = vector.broadcast %191 : vector<16x1xf32> to vector<16x32xf32>
    %200 = arith.subf %187, %199 : vector<16x32xf32>
    %cst_62 = arith.constant 9.99999996E-13 : f32
    %201 = vector.broadcast %cst_62 : f32 to vector<16x1xf32>
    %202 = arith.addf %198, %201 : vector<16x1xf32>
    %203 = math.rsqrt %202 : vector<16x1xf32>
    %204 = vector.broadcast %203 : vector<16x1xf32> to vector<16x32xf32>
    %205 = arith.mulf %200, %204 : vector<16x32xf32>
    %206 = vector.broadcast %43 : vector<1x32xf32> to vector<16x32xf32>
    %207 = arith.mulf %205, %206 : vector<16x32xf32>
    %208 = vector.broadcast %44 : vector<1x32xf32> to vector<16x32xf32>
    %209 = arith.addf %207, %208 : vector<16x32xf32>
    %c1 = arith.constant 1 : index
    %c0_63 = arith.constant 0 : index
    %c0_64 = arith.constant 0 : index
    %210 = vector.load %arg3[%c1, %c0_63, %c0_64] : memref<2x32x96xbf16, #tpu.memory_space<vmem>>, vector<1x32x96xbf16>
    %211 = vector.shape_cast %210 : vector<1x32x96xbf16> to vector<32x96xbf16>
    %c1_65 = arith.constant 1 : index
    %c0_66 = arith.constant 0 : index
    %c0_67 = arith.constant 0 : index
    %212 = vector.load %arg4[%c1_65, %c0_66, %c0_67] : memref<2x32x32xbf16, #tpu.memory_space<vmem>>, vector<1x32x32xbf16>
    %213 = vector.shape_cast %212 : vector<1x32x32xbf16> to vector<32x32xbf16>
    %c1_68 = arith.constant 1 : index
    %c0_69 = arith.constant 0 : index
    %c0_70 = arith.constant 0 : index
    %214 = vector.load %arg5[%c1_68, %c0_69, %c0_70] : memref<2x32x64xbf16, #tpu.memory_space<vmem>>, vector<1x32x64xbf16>
    %215 = vector.shape_cast %214 : vector<1x32x64xbf16> to vector<32x64xbf16>
    %c1_71 = arith.constant 1 : index
    %c0_72 = arith.constant 0 : index
    %c0_73 = arith.constant 0 : index
    %216 = vector.load %arg6[%c1_71, %c0_72, %c0_73] : memref<2x64x32xbf16, #tpu.memory_space<vmem>>, vector<1x64x32xbf16>
    %217 = vector.shape_cast %216 : vector<1x64x32xbf16> to vector<64x32xbf16>
    %c1_74 = arith.constant 1 : index
    %c0_75 = arith.constant 0 : index
    %c0_76 = arith.constant 0 : index
    %218 = vector.load %arg7[%c1_74, %c0_75, %c0_76] : memref<2x8x128xf32, #tpu.memory_space<vmem>>, vector<1x8x128xf32>
    %219 = vector.shape_cast %218 : vector<1x8x128xf32> to vector<8x128xf32>
    %220 = vector.extract_strided_slice %219 {offsets = [0, 0], sizes = [1, 96], strides = [1, 1]} : vector<8x128xf32> to vector<1x96xf32>
    %221 = vector.extract_strided_slice %219 {offsets = [1, 0], sizes = [1, 32], strides = [1, 1]} : vector<8x128xf32> to vector<1x32xf32>
    %222 = vector.extract_strided_slice %219 {offsets = [2, 0], sizes = [1, 32], strides = [1, 1]} : vector<8x128xf32> to vector<1x32xf32>
    %223 = vector.extract_strided_slice %219 {offsets = [3, 0], sizes = [1, 32], strides = [1, 1]} : vector<8x128xf32> to vector<1x32xf32>
    %224 = vector.extract_strided_slice %219 {offsets = [4, 0], sizes = [1, 64], strides = [1, 1]} : vector<8x128xf32> to vector<1x64xf32>
    %225 = vector.extract_strided_slice %219 {offsets = [5, 0], sizes = [1, 32], strides = [1, 1]} : vector<8x128xf32> to vector<1x32xf32>
    %226 = vector.extract_strided_slice %219 {offsets = [6, 0], sizes = [1, 32], strides = [1, 1]} : vector<8x128xf32> to vector<1x32xf32>
    %227 = vector.extract_strided_slice %219 {offsets = [7, 0], sizes = [1, 32], strides = [1, 1]} : vector<8x128xf32> to vector<1x32xf32>
    %228 = arith.truncf %209 : vector<16x32xf32> to vector<16x32xbf16>
    %cst_77 = arith.constant dense<0.000000e+00> : vector<16x96xf32>
    %229 = tpu.matmul %228, %211, %cst_77 {dimension_numbers = #tpu.dot_dimension_numbers<[1], [0], [0], [1], [0, 0, 1, 1], [], []>} : vector<16x32xbf16>, vector<32x96xbf16>, vector<16x96xf32> -> vector<16x96xf32>
    %230 = vector.broadcast %220 : vector<1x96xf32> to vector<16x96xf32>
    %231 = arith.addf %229, %230 : vector<16x96xf32>
    %232 = vector.extract_strided_slice %231 {offsets = [0, 0], sizes = [16, 8], strides = [1, 1]} : vector<16x96xf32> to vector<16x8xf32>
    %233 = vector.shape_cast %232 : vector<16x8xf32> to vector<2x8x8xf32>
    %234 = vector.extract_strided_slice %231 {offsets = [0, 32], sizes = [16, 8], strides = [1, 1]} : vector<16x96xf32> to vector<16x8xf32>
    %235 = vector.shape_cast %234 : vector<16x8xf32> to vector<2x8x8xf32>
    %236 = vector.extract_strided_slice %231 {offsets = [0, 64], sizes = [16, 8], strides = [1, 1]} : vector<16x96xf32> to vector<16x8xf32>
    %237 = vector.shape_cast %236 : vector<16x8xf32> to vector<2x8x8xf32>
    "tpu.trace_start"() <{level = 10 : i32, message = "bqd,bkd->bqk"}> : () -> ()
    %cst_78 = arith.constant dense<0.000000e+00> : vector<2x8x8xf32>
    %238 = tpu.matmul %233, %235, %cst_78 {dimension_numbers = #tpu.dot_dimension_numbers<[2], [2], [1], [1], [0, 0, 0, 1, 1, 1], [0], [0]>} : vector<2x8x8xf32>, vector<2x8x8xf32>, vector<2x8x8xf32> -> vector<2x8x8xf32>
    "tpu.trace_stop"() : () -> ()
    %cst_79 = arith.constant 0.353553385 : f32
    %239 = vector.broadcast %cst_79 : f32 to vector<2x8x8xf32>
    %240 = arith.mulf %238, %239 : vector<2x8x8xf32>
    %241 = vector.broadcast %26 : vector<2x1x8xf32> to vector<2x8x8xf32>
    %242 = arith.addf %240, %241 : vector<2x8x8xf32>
    %cst_80 = arith.constant dense<0xFF800000> : vector<2x8xf32>
    %243 = vector.multi_reduction <maximumf>, %242, %cst_80 [2] : vector<2x8x8xf32> to vector<2x8xf32>
    %244 = vector.shape_cast %243 : vector<2x8xf32> to vector<2x8x1xf32>
    %245 = vector.broadcast %244 : vector<2x8x1xf32> to vector<2x8x8xf32>
    %246 = arith.subf %242, %245 : vector<2x8x8xf32>
    %247 = math.exp %246 : vector<2x8x8xf32>
    %cst_81 = arith.constant dense<0.000000e+00> : vector<2x8xf32>
    %248 = vector.multi_reduction <add>, %247, %cst_81 [2] : vector<2x8x8xf32> to vector<2x8xf32>
    %249 = vector.shape_cast %248 : vector<2x8xf32> to vector<2x8x1xf32>
    %250 = tpu.reciprocal %249 {approx = true} : vector<2x8x1xf32> -> vector<2x8x1xf32>
    %251 = vector.broadcast %250 : vector<2x8x1xf32> to vector<2x8x8xf32>
    %252 = arith.mulf %247, %251 : vector<2x8x8xf32>
    "tpu.trace_start"() <{level = 10 : i32, message = "bqk,bkd->bqd"}> : () -> ()
    %cst_82 = arith.constant dense<0.000000e+00> : vector<2x8x8xf32>
    %253 = tpu.matmul %252, %237, %cst_82 {dimension_numbers = #tpu.dot_dimension_numbers<[2], [1], [1], [2], [0, 0, 0, 1, 1, 2], [0], [0]>} : vector<2x8x8xf32>, vector<2x8x8xf32>, vector<2x8x8xf32> -> vector<2x8x8xf32>
    "tpu.trace_stop"() : () -> ()
    %254 = vector.extract_strided_slice %231 {offsets = [0, 8], sizes = [16, 8], strides = [1, 1]} : vector<16x96xf32> to vector<16x8xf32>
    %255 = vector.shape_cast %254 : vector<16x8xf32> to vector<2x8x8xf32>
    %256 = vector.extract_strided_slice %231 {offsets = [0, 40], sizes = [16, 8], strides = [1, 1]} : vector<16x96xf32> to vector<16x8xf32>
    %257 = vector.shape_cast %256 : vector<16x8xf32> to vector<2x8x8xf32>
    %258 = vector.extract_strided_slice %231 {offsets = [0, 72], sizes = [16, 8], strides = [1, 1]} : vector<16x96xf32> to vector<16x8xf32>
    %259 = vector.shape_cast %258 : vector<16x8xf32> to vector<2x8x8xf32>
    "tpu.trace_start"() <{level = 10 : i32, message = "bqd,bkd->bqk"}> : () -> ()
    %cst_83 = arith.constant dense<0.000000e+00> : vector<2x8x8xf32>
    %260 = tpu.matmul %255, %257, %cst_83 {dimension_numbers = #tpu.dot_dimension_numbers<[2], [2], [1], [1], [0, 0, 0, 1, 1, 1], [0], [0]>} : vector<2x8x8xf32>, vector<2x8x8xf32>, vector<2x8x8xf32> -> vector<2x8x8xf32>
    "tpu.trace_stop"() : () -> ()
    %cst_84 = arith.constant 0.353553385 : f32
    %261 = vector.broadcast %cst_84 : f32 to vector<2x8x8xf32>
    %262 = arith.mulf %260, %261 : vector<2x8x8xf32>
    %263 = vector.broadcast %26 : vector<2x1x8xf32> to vector<2x8x8xf32>
    %264 = arith.addf %262, %263 : vector<2x8x8xf32>
    %cst_85 = arith.constant dense<0xFF800000> : vector<2x8xf32>
    %265 = vector.multi_reduction <maximumf>, %264, %cst_85 [2] : vector<2x8x8xf32> to vector<2x8xf32>
    %266 = vector.shape_cast %265 : vector<2x8xf32> to vector<2x8x1xf32>
    %267 = vector.broadcast %266 : vector<2x8x1xf32> to vector<2x8x8xf32>
    %268 = arith.subf %264, %267 : vector<2x8x8xf32>
    %269 = math.exp %268 : vector<2x8x8xf32>
    %cst_86 = arith.constant dense<0.000000e+00> : vector<2x8xf32>
    %270 = vector.multi_reduction <add>, %269, %cst_86 [2] : vector<2x8x8xf32> to vector<2x8xf32>
    %271 = vector.shape_cast %270 : vector<2x8xf32> to vector<2x8x1xf32>
    %272 = tpu.reciprocal %271 {approx = true} : vector<2x8x1xf32> -> vector<2x8x1xf32>
    %273 = vector.broadcast %272 : vector<2x8x1xf32> to vector<2x8x8xf32>
    %274 = arith.mulf %269, %273 : vector<2x8x8xf32>
    "tpu.trace_start"() <{level = 10 : i32, message = "bqk,bkd->bqd"}> : () -> ()
    %cst_87 = arith.constant dense<0.000000e+00> : vector<2x8x8xf32>
    %275 = tpu.matmul %274, %259, %cst_87 {dimension_numbers = #tpu.dot_dimension_numbers<[2], [1], [1], [2], [0, 0, 0, 1, 1, 2], [0], [0]>} : vector<2x8x8xf32>, vector<2x8x8xf32>, vector<2x8x8xf32> -> vector<2x8x8xf32>
    "tpu.trace_stop"() : () -> ()
    %276 = vector.extract_strided_slice %231 {offsets = [0, 16], sizes = [16, 8], strides = [1, 1]} : vector<16x96xf32> to vector<16x8xf32>
    %277 = vector.shape_cast %276 : vector<16x8xf32> to vector<2x8x8xf32>
    %278 = vector.extract_strided_slice %231 {offsets = [0, 48], sizes = [16, 8], strides = [1, 1]} : vector<16x96xf32> to vector<16x8xf32>
    %279 = vector.shape_cast %278 : vector<16x8xf32> to vector<2x8x8xf32>
    %280 = vector.extract_strided_slice %231 {offsets = [0, 80], sizes = [16, 8], strides = [1, 1]} : vector<16x96xf32> to vector<16x8xf32>
    %281 = vector.shape_cast %280 : vector<16x8xf32> to vector<2x8x8xf32>
    "tpu.trace_start"() <{level = 10 : i32, message = "bqd,bkd->bqk"}> : () -> ()
    %cst_88 = arith.constant dense<0.000000e+00> : vector<2x8x8xf32>
    %282 = tpu.matmul %277, %279, %cst_88 {dimension_numbers = #tpu.dot_dimension_numbers<[2], [2], [1], [1], [0, 0, 0, 1, 1, 1], [0], [0]>} : vector<2x8x8xf32>, vector<2x8x8xf32>, vector<2x8x8xf32> -> vector<2x8x8xf32>
    "tpu.trace_stop"() : () -> ()
    %cst_89 = arith.constant 0.353553385 : f32
    %283 = vector.broadcast %cst_89 : f32 to vector<2x8x8xf32>
    %284 = arith.mulf %282, %283 : vector<2x8x8xf32>
    %285 = vector.broadcast %26 : vector<2x1x8xf32> to vector<2x8x8xf32>
    %286 = arith.addf %284, %285 : vector<2x8x8xf32>
    %cst_90 = arith.constant dense<0xFF800000> : vector<2x8xf32>
    %287 = vector.multi_reduction <maximumf>, %286, %cst_90 [2] : vector<2x8x8xf32> to vector<2x8xf32>
    %288 = vector.shape_cast %287 : vector<2x8xf32> to vector<2x8x1xf32>
    %289 = vector.broadcast %288 : vector<2x8x1xf32> to vector<2x8x8xf32>
    %290 = arith.subf %286, %289 : vector<2x8x8xf32>
    %291 = math.exp %290 : vector<2x8x8xf32>
    %cst_91 = arith.constant dense<0.000000e+00> : vector<2x8xf32>
    %292 = vector.multi_reduction <add>, %291, %cst_91 [2] : vector<2x8x8xf32> to vector<2x8xf32>
    %293 = vector.shape_cast %292 : vector<2x8xf32> to vector<2x8x1xf32>
    %294 = tpu.reciprocal %293 {approx = true} : vector<2x8x1xf32> -> vector<2x8x1xf32>
    %295 = vector.broadcast %294 : vector<2x8x1xf32> to vector<2x8x8xf32>
    %296 = arith.mulf %291, %295 : vector<2x8x8xf32>
    "tpu.trace_start"() <{level = 10 : i32, message = "bqk,bkd->bqd"}> : () -> ()
    %cst_92 = arith.constant dense<0.000000e+00> : vector<2x8x8xf32>
    %297 = tpu.matmul %296, %281, %cst_92 {dimension_numbers = #tpu.dot_dimension_numbers<[2], [1], [1], [2], [0, 0, 0, 1, 1, 2], [0], [0]>} : vector<2x8x8xf32>, vector<2x8x8xf32>, vector<2x8x8xf32> -> vector<2x8x8xf32>
    "tpu.trace_stop"() : () -> ()
    %298 = vector.extract_strided_slice %231 {offsets = [0, 24], sizes = [16, 8], strides = [1, 1]} : vector<16x96xf32> to vector<16x8xf32>
    %299 = vector.shape_cast %298 : vector<16x8xf32> to vector<2x8x8xf32>
    %300 = vector.extract_strided_slice %231 {offsets = [0, 56], sizes = [16, 8], strides = [1, 1]} : vector<16x96xf32> to vector<16x8xf32>
    %301 = vector.shape_cast %300 : vector<16x8xf32> to vector<2x8x8xf32>
    %302 = vector.extract_strided_slice %231 {offsets = [0, 88], sizes = [16, 8], strides = [1, 1]} : vector<16x96xf32> to vector<16x8xf32>
    %303 = vector.shape_cast %302 : vector<16x8xf32> to vector<2x8x8xf32>
    "tpu.trace_start"() <{level = 10 : i32, message = "bqd,bkd->bqk"}> : () -> ()
    %cst_93 = arith.constant dense<0.000000e+00> : vector<2x8x8xf32>
    %304 = tpu.matmul %299, %301, %cst_93 {dimension_numbers = #tpu.dot_dimension_numbers<[2], [2], [1], [1], [0, 0, 0, 1, 1, 1], [0], [0]>} : vector<2x8x8xf32>, vector<2x8x8xf32>, vector<2x8x8xf32> -> vector<2x8x8xf32>
    "tpu.trace_stop"() : () -> ()
    %cst_94 = arith.constant 0.353553385 : f32
    %305 = vector.broadcast %cst_94 : f32 to vector<2x8x8xf32>
    %306 = arith.mulf %304, %305 : vector<2x8x8xf32>
    %307 = vector.broadcast %26 : vector<2x1x8xf32> to vector<2x8x8xf32>
    %308 = arith.addf %306, %307 : vector<2x8x8xf32>
    %cst_95 = arith.constant dense<0xFF800000> : vector<2x8xf32>
    %309 = vector.multi_reduction <maximumf>, %308, %cst_95 [2] : vector<2x8x8xf32> to vector<2x8xf32>
    %310 = vector.shape_cast %309 : vector<2x8xf32> to vector<2x8x1xf32>
    %311 = vector.broadcast %310 : vector<2x8x1xf32> to vector<2x8x8xf32>
    %312 = arith.subf %308, %311 : vector<2x8x8xf32>
    %313 = math.exp %312 : vector<2x8x8xf32>
    %cst_96 = arith.constant dense<0.000000e+00> : vector<2x8xf32>
    %314 = vector.multi_reduction <add>, %313, %cst_96 [2] : vector<2x8x8xf32> to vector<2x8xf32>
    %315 = vector.shape_cast %314 : vector<2x8xf32> to vector<2x8x1xf32>
    %316 = tpu.reciprocal %315 {approx = true} : vector<2x8x1xf32> -> vector<2x8x1xf32>
    %317 = vector.broadcast %316 : vector<2x8x1xf32> to vector<2x8x8xf32>
    %318 = arith.mulf %313, %317 : vector<2x8x8xf32>
    "tpu.trace_start"() <{level = 10 : i32, message = "bqk,bkd->bqd"}> : () -> ()
    %cst_97 = arith.constant dense<0.000000e+00> : vector<2x8x8xf32>
    %319 = tpu.matmul %318, %303, %cst_97 {dimension_numbers = #tpu.dot_dimension_numbers<[2], [1], [1], [2], [0, 0, 0, 1, 1, 2], [0], [0]>} : vector<2x8x8xf32>, vector<2x8x8xf32>, vector<2x8x8xf32> -> vector<2x8x8xf32>
    "tpu.trace_stop"() : () -> ()
    %320 = tpu.concatenate %253, %275, %297, %319 in 2 : vector<2x8x8xf32>, vector<2x8x8xf32>, vector<2x8x8xf32>, vector<2x8x8xf32> -> vector<2x8x32xf32>
    %321 = vector.shape_cast %320 : vector<2x8x32xf32> to vector<16x32xf32>
    %322 = arith.truncf %321 : vector<16x32xf32> to vector<16x32xbf16>
    %cst_98 = arith.constant dense<0.000000e+00> : vector<16x32xf32>
    %323 = tpu.matmul %322, %213, %cst_98 {dimension_numbers = #tpu.dot_dimension_numbers<[1], [0], [0], [1], [0, 0, 1, 1], [], []>} : vector<16x32xbf16>, vector<32x32xbf16>, vector<16x32xf32> -> vector<16x32xf32>
    %324 = vector.broadcast %221 : vector<1x32xf32> to vector<16x32xf32>
    %325 = arith.addf %323, %324 : vector<16x32xf32>
    %326 = arith.addf %325, %209 : vector<16x32xf32>
    %cst_99 = arith.constant dense<0.000000e+00> : vector<16xf32>
    %327 = vector.multi_reduction <add>, %326, %cst_99 [1] : vector<16x32xf32> to vector<16xf32>
    %328 = vector.shape_cast %327 : vector<16xf32> to vector<16x1xf32>
    %cst_100 = arith.constant 3.200000e+01 : f32
    %329 = vector.broadcast %cst_100 : f32 to vector<16x1xf32>
    %330 = arith.divf %328, %329 : vector<16x1xf32>
    %331 = vector.broadcast %330 : vector<16x1xf32> to vector<16x32xf32>
    %332 = arith.subf %326, %331 : vector<16x32xf32>
    %333 = arith.mulf %332, %332 : vector<16x32xf32>
    %cst_101 = arith.constant dense<0.000000e+00> : vector<16xf32>
    %334 = vector.multi_reduction <add>, %333, %cst_101 [1] : vector<16x32xf32> to vector<16xf32>
    %335 = vector.shape_cast %334 : vector<16xf32> to vector<16x1xf32>
    %cst_102 = arith.constant 3.200000e+01 : f32
    %336 = vector.broadcast %cst_102 : f32 to vector<16x1xf32>
    %337 = arith.divf %335, %336 : vector<16x1xf32>
    %338 = vector.broadcast %330 : vector<16x1xf32> to vector<16x32xf32>
    %339 = arith.subf %326, %338 : vector<16x32xf32>
    %cst_103 = arith.constant 9.99999996E-13 : f32
    %340 = vector.broadcast %cst_103 : f32 to vector<16x1xf32>
    %341 = arith.addf %337, %340 : vector<16x1xf32>
    %342 = math.rsqrt %341 : vector<16x1xf32>
    %343 = vector.broadcast %342 : vector<16x1xf32> to vector<16x32xf32>
    %344 = arith.mulf %339, %343 : vector<16x32xf32>
    %345 = vector.broadcast %222 : vector<1x32xf32> to vector<16x32xf32>
    %346 = arith.mulf %344, %345 : vector<16x32xf32>
    %347 = vector.broadcast %223 : vector<1x32xf32> to vector<16x32xf32>
    %348 = arith.addf %346, %347 : vector<16x32xf32>
    %349 = arith.truncf %348 : vector<16x32xf32> to vector<16x32xbf16>
    %cst_104 = arith.constant dense<0.000000e+00> : vector<16x64xf32>
    %350 = tpu.matmul %349, %215, %cst_104 {dimension_numbers = #tpu.dot_dimension_numbers<[1], [0], [0], [1], [0, 0, 1, 1], [], []>} : vector<16x32xbf16>, vector<32x64xbf16>, vector<16x64xf32> -> vector<16x64xf32>
    %351 = vector.broadcast %224 : vector<1x64xf32> to vector<16x64xf32>
    %352 = arith.addf %350, %351 : vector<16x64xf32>
    %353 = arith.mulf %352, %352 : vector<16x64xf32>
    %354 = arith.mulf %352, %353 : vector<16x64xf32>
    %cst_105 = arith.constant 4.471500e-02 : f32
    %355 = vector.broadcast %cst_105 : f32 to vector<16x64xf32>
    %356 = arith.mulf %355, %354 : vector<16x64xf32>
    %357 = arith.addf %352, %356 : vector<16x64xf32>
    %cst_106 = arith.constant 0.797884583 : f32
    %358 = vector.broadcast %cst_106 : f32 to vector<16x64xf32>
    %359 = arith.mulf %358, %357 : vector<16x64xf32>
    %360 = math.tanh %359 : vector<16x64xf32>
    %cst_107 = arith.constant 1.000000e+00 : f32
    %361 = vector.broadcast %cst_107 : f32 to vector<16x64xf32>
    %362 = arith.addf %361, %360 : vector<16x64xf32>
    %cst_108 = arith.constant 5.000000e-01 : f32
    %363 = vector.broadcast %cst_108 : f32 to vector<16x64xf32>
    %364 = arith.mulf %363, %362 : vector<16x64xf32>
    %365 = arith.mulf %352, %364 : vector<16x64xf32>
    %366 = arith.truncf %365 : vector<16x64xf32> to vector<16x64xbf16>
    %cst_109 = arith.constant dense<0.000000e+00> : vector<16x32xf32>
    %367 = tpu.matmul %366, %217, %cst_109 {dimension_numbers = #tpu.dot_dimension_numbers<[1], [0], [0], [1], [0, 0, 1, 1], [], []>} : vector<16x64xbf16>, vector<64x32xbf16>, vector<16x32xf32> -> vector<16x32xf32>
    %368 = vector.broadcast %225 : vector<1x32xf32> to vector<16x32xf32>
    %369 = arith.addf %367, %368 : vector<16x32xf32>
    %370 = arith.addf %369, %348 : vector<16x32xf32>
    %cst_110 = arith.constant dense<0.000000e+00> : vector<16xf32>
    %371 = vector.multi_reduction <add>, %370, %cst_110 [1] : vector<16x32xf32> to vector<16xf32>
    %372 = vector.shape_cast %371 : vector<16xf32> to vector<16x1xf32>
    %cst_111 = arith.constant 3.200000e+01 : f32
    %373 = vector.broadcast %cst_111 : f32 to vector<16x1xf32>
    %374 = arith.divf %372, %373 : vector<16x1xf32>
    %375 = vector.broadcast %374 : vector<16x1xf32> to vector<16x32xf32>
    %376 = arith.subf %370, %375 : vector<16x32xf32>
    %377 = arith.mulf %376, %376 : vector<16x32xf32>
    %cst_112 = arith.constant dense<0.000000e+00> : vector<16xf32>
    %378 = vector.multi_reduction <add>, %377, %cst_112 [1] : vector<16x32xf32> to vector<16xf32>
    %379 = vector.shape_cast %378 : vector<16xf32> to vector<16x1xf32>
    %cst_113 = arith.constant 3.200000e+01 : f32
    %380 = vector.broadcast %cst_113 : f32 to vector<16x1xf32>
    %381 = arith.divf %379, %380 : vector<16x1xf32>
    %382 = vector.broadcast %374 : vector<16x1xf32> to vector<16x32xf32>
    %383 = arith.subf %370, %382 : vector<16x32xf32>
    %cst_114 = arith.constant 9.99999996E-13 : f32
    %384 = vector.broadcast %cst_114 : f32 to vector<16x1xf32>
    %385 = arith.addf %381, %384 : vector<16x1xf32>
    %386 = math.rsqrt %385 : vector<16x1xf32>
    %387 = vector.broadcast %386 : vector<16x1xf32> to vector<16x32xf32>
    %388 = arith.mulf %383, %387 : vector<16x32xf32>
    %389 = vector.broadcast %226 : vector<1x32xf32> to vector<16x32xf32>
    %390 = arith.mulf %388, %389 : vector<16x32xf32>
    %391 = vector.broadcast %227 : vector<1x32xf32> to vector<16x32xf32>
    %392 = arith.addf %390, %391 : vector<16x32xf32>
    %393 = vector.shape_cast %392 : vector<16x32xf32> to vector<2x8x32xf32>
    %394 = vector.extract_strided_slice %393 {offsets = [0, 0, 0], sizes = [2, 1, 32], strides = [1, 1, 1]} : vector<2x8x32xf32> to vector<2x1x32xf32>
    %395 = vector.shape_cast %394 : vector<2x1x32xf32> to vector<2x32xf32>
    %396 = arith.truncf %395 : vector<2x32xf32> to vector<2x32xbf16>
    %c0_115 = arith.constant 0 : index
    %c0_116 = arith.constant 0 : index
    %397 = vector.load %arg8[%c0_115, %c0_116] : memref<32x32xbf16, #tpu.memory_space<vmem>>, vector<32x32xbf16>
    %cst_117 = arith.constant dense<0.000000e+00> : vector<2x32xf32>
    %398 = tpu.matmul %396, %397, %cst_117 {dimension_numbers = #tpu.dot_dimension_numbers<[1], [0], [0], [1], [0, 0, 1, 1], [], []>} : vector<2x32xbf16>, vector<32x32xbf16>, vector<2x32xf32> -> vector<2x32xf32>
    %c0_118 = arith.constant 0 : index
    %c0_119 = arith.constant 0 : index
    %399 = vector.load %arg9[%c0_118, %c0_119] : memref<1x32xf32, #tpu.memory_space<vmem>>, vector<1x32xf32>
    %400 = vector.broadcast %399 : vector<1x32xf32> to vector<2x32xf32>
    %401 = arith.addf %398, %400 : vector<2x32xf32>
    %cst_120 = arith.constant 0.000000e+00 : f32
    %402 = vector.broadcast %cst_120 : f32 to vector<2x32xf32>
    %403 = arith.maximumf %401, %402 : vector<2x32xf32>
    %404 = arith.truncf %403 : vector<2x32xf32> to vector<2x32xbf16>
    %c0_121 = arith.constant 0 : index
    %c0_122 = arith.constant 0 : index
    %405 = vector.load %arg10[%c0_121, %c0_122] : memref<32x128xbf16, #tpu.memory_space<vmem>>, vector<32x128xbf16>
    %cst_123 = arith.constant dense<0.000000e+00> : vector<2x128xf32>
    %406 = tpu.matmul %404, %405, %cst_123 {dimension_numbers = #tpu.dot_dimension_numbers<[1], [0], [0], [1], [0, 0, 1, 1], [], []>} : vector<2x32xbf16>, vector<32x128xbf16>, vector<2x128xf32> -> vector<2x128xf32>
    %c0_124 = arith.constant 0 : index
    %c0_125 = arith.constant 0 : index
    %407 = vector.load %arg11[%c0_124, %c0_125] : memref<1x128xf32, #tpu.memory_space<vmem>>, vector<1x128xf32>
    %408 = vector.broadcast %407 : vector<1x128xf32> to vector<2x128xf32>
    %409 = arith.addf %406, %408 : vector<2x128xf32>
    %c0_126 = arith.constant 0 : index
    %c0_127 = arith.constant 0 : index
    %410 = vector.load %arg12[%c0_126, %c0_127] : memref<2x128xf32, #tpu.memory_space<vmem>>, vector<2x128xf32>
    tpu.vector_store %arg12[%c0_126, %c0_127], %409 {strides = array<i32>} : memref<2x128xf32, #tpu.memory_space<vmem>>, vector<2x128xf32>,
    return
  }
}

</mosaic_0001>

<bundles_post_ra>
// kernel: roberta_class_forward.1
= control target key start
LH: loop header
LB: loop body
LE: loop exit
PB: predicated region body
PF: predicated region fallthrough
CT: control target
= control target key end

     0   :  { %vm46_vm0 = vcmask 261120   ;;  %s5078_s0 = inlined_call_operand.vmem [shape: f32[16,32], index: 0, kind: input, shape index: {}]   ;;  %s5079_s1 = inlined_call_operand.vmem [shape: f32[2,1,8], index: 1, kind: input, shape index: {}]   ;;  %s5080_s2 = inlined_call_operand.vmem [shape: f32[2,32], index: 2, kind: input, shape index: {}]   ;;  %s5081_s3 = inlined_call_operand.vmem [shape: bf16[2,32,96], index: 3, kind: input, shape index: {}]   ;;  %s5082_s4 = inlined_call_operand.vmem [shape: bf16[2,32,32], index: 4, kind: input, shape index: {}]   ;;  %s5083_s5 = inlined_call_operand.vmem [shape: bf16[2,32,64], index: 5, kind: input, shape index: {}]   ;;  %s5084_s6 = inlined_call_operand.vmem [shape: bf16[2,64,32], index: 6, kind: input, shape index: {}]   ;;  %s5085_s7 = inlined_call_operand.vmem [shape: f32[2,8,128], index: 7, kind: input, shape index: {}]   ;;  %s5086_s8 = inlined_call_operand.vmem [shape: bf16[32,32], index: 8, kind: input, shape index: {}]   ;;  %s5087_s9 = inlined_call_operand.vmem [shape: f32[1,32], index: 9, kind: input, shape index: {}]   ;;  %s5088_s10 = inlined_call_operand.vmem [shape: bf16[32,128], index: 10, kind: input, shape index: {}]   ;;  %s5089_s11 = inlined_call_operand.vmem [shape: f32[1,128], index: 11, kind: input, shape index: {}]   ;;  %s5090_s12 = inlined_call_operand.hbm [shape: f32[2,128], index: 12, kind: output, shape index: {}]  }
   0x1   :  { %v44_v0 = vld [vmem:[%s5078_s0] sm:$0xff]  ;;  %v45_v1 = vld [vmem:[%s5078_s0 + $0x8] sm:$0xff] }
   0x2   :  { %v47_v2 = vsel %vm46_vm0, %v44_v0, 0.0  ;;  %v50_v3 = vsel %vm46_vm0, %v45_v1, 0.0 }
   0x3   :  { %48 = vadd.xlane.f32.xlu0 %v47_v2 }
   0x7   :  { %51 = vadd.xlane.f32.xlu0 %v50_v3 }
   0x8   :  { %17 = vsyncpa [#allocation3], 0  ;;  %v4246_v14 = vld [vmem:[%s5081_s3 + $0x8] sm:$0xff]   ;;  %v4386_v15 = vmov 0.0   ;;  %vm4387_vm1 = vmmov 0   ;;  %v4247_v16 = vld [vmem:[%s5081_s3] sm:$0xff]   ;;  %v74_v23 = vlaneseq }
   0x9   :  { %3951 = vmatprep.subr.bf16.mxu0 %v4386_v15  ;;  %3955 = vmatprep.mubr.msk.bf16.mxu0 %vm4387_vm1, %v4386_v15  ;;  %v43_v26 = vld [vmem:[%s5080_s2] sm:$0x3]  ;;  %s4388_s13 = smov 96   ;;  %vm173_vm2 = vcmask 64512   ;;  %s4389_s18 = smov 64   ;;  %vm1543_vm3 = vcmask 130048  }
   0xa   :  { %3952 = vmatpush3.bf16.msra.mxu0 %v4246_v14  ;;  %3959 = vmatprep.subr.mxu1 %v4386_v15  ;;  %v4492_v24 = vshrl.u32 %v74_v23, 7  ;;  %v4517_v39 = vld [vmem:[%s5085_s7] sm:$0xff]  ;;  %s4390_s19 = smov 88   ;;  %s4391_s20 = smov 120   ;;  %vm1546_vm4 = vcmask 195584   ;;  %vm1758_vm5 = vcmask 523264  }
   0xb   :  { %3953 = vmatprep.subr.bf16.mxu0 %v4386_v15  ;;  %3961 = vmatprep.mubr.msk.f32.mxu1 %vm4387_vm1, %v4386_v15  ;;  %v4544_v50 = vld [vmem:[%s5079_s1] ss:$0 sm:$0xff]  ;;  %v4550_v55 = vld [vmem:[%s5079_s1 + $0x1] ss:$0 sm:$0xff]  ;;  %s4392_s21 = smov 56   ;;  %s4393_s22 = smov 80  }
   0xc   :  { %v4495_v25 = vsub.s32 0, %v4492_v24  ;;  %v4502_v30 = vsub.s32 1, %v4492_v24  ;;  %s4394_s23 = smov 112   ;;  %s4395_s24 = smov 48   ;;  %vm3605_vm6 = vcmask 1041409  }
   0xd   :  { %s4396_s0 = smov 72   ;;  %s4397_s25 = smov 104  }
   0xe   :  { %3954 = vmatpush3.bf16.msra.mxu0 %v4247_v16  ;;  %v77_v29 = vrot.slane %v43_v26, %v4495_v25  ;;  %v83_v34 = vrot.slane %v43_v26, %v4502_v30  ;;  %v113_v40 = vrot.slane %v4517_v39, %v4495_v25  ;;  %s4398_s26 = smov 40   ;;  %s4399_s27 = smov 8  }
   0xf   :  { %3974 = vmatprep.subr.mxu0 %v4386_v15  ;;  %s4400_s28 = smov 16   ;;  %s5091_s15 = smov 24  }
  0x8c   :  { %v49_v4 = vpop.xlane.xlu0 %48 }
  0x8d   :  { %v54_v5 = vmul.f32 0.03125, %v49_v4 }
  0x8f   :  { %v56_v6 = vsub.f32 %v44_v0, %v54_v5 }
  0x90   :  { %v52_v7 = vpop.xlane.xlu0 %51 }
  0x91   :  { %v55_v8 = vmul.f32 0.03125, %v52_v7  ;;  %v58_v9 = vmul.f32 %v56_v6, %v56_v6 }
  0x93   :  { %v57_v10 = vsub.f32 %v45_v1, %v55_v8  ;;  %v60_v11 = vsel %vm46_vm0, %v58_v9, 0.0 }
  0x94   :  { %61 = vadd.xlane.f32.xlu1 %v60_v11 }
  0x95   :  { %v59_v12 = vmul.f32 %v57_v10, %v57_v10 }
  0x97   :  { %v63_v13 = vsel %vm46_vm0, %v59_v12, 0.0 }
  0x98   :  { %64 = vadd.xlane.f32.xlu1 %v63_v13 }
 0x11d   :  { %v62_v17 = vpop.xlane.xlu1 %61 }
 0x11e   :  { %v66_v18 = vmul.f32 0.03125, %v62_v17 }
 0x120   :  { %v68_v19 = vadd.f32 1e-12, %v66_v18 }
 0x121   :  { %v65_v20 = vpop.xlane.xlu1 %64 }
 0x122   :  { %4270 = vrsqrt.f32 %v68_v19  ;;  %v67_v21 = vmul.f32 0.03125, %v65_v20 }
 0x124   :  { %v69_v22 = vadd.f32 1e-12, %v67_v21 }
 0x126   :  { %4272 = vrsqrt.f32 %v69_v22 }
 0x12f   :  { %v4271_v27 = vpop.eup %4270 }
 0x130   :  { %v72_v28 = vmul.f32 %v4271_v27, %v56_v6 }
 0x132   :  { %v78_v33 = vmul.f32 %v77_v29, %v72_v28 }
 0x133   :  { %v4273_v31 = vpop.eup %4272 }
 0x134   :  { %v73_v32 = vmul.f32 %v4273_v31, %v57_v10  ;;  %v4505_v36 = vadd.f32 %v83_v34, %v78_v33 }
 0x136   :  { %v79_v35 = vmul.f32 %v77_v29, %v73_v32 }
 0x138   :  { %v4507_v37 = vadd.f32 %v83_v34, %v79_v35 }
 0x13a   :  { %v109_v38 = vpack.c.bf16 %v4507_v37, %v4505_v36 }
 0x13c   :  { %3956 = vmatmul.mubr.msk.bf16.vlgmr.msra.gmra.mxu0 %vm46_vm0, %v109_v38 }
 0x13d   :  { %3976 = vmatprep.mubr.msk.f32.mxu0 %vm4387_vm1, %v4386_v15 }
 0x1fc   :  { %v163_v41 = vpop.f32.mrf.mxu0 }
 0x1fd   :  { %v4521_v42 = vadd.f32 %v163_v41, %v113_v40 }
 0x1fe   :  { %v3957_v43 = vpop.f32.mrf.mxu0 }
 0x1ff   :  { %171 = vrot.lane.b32.xlu0 %v4521_v42, %s4388_s13 }
 0x200   :  { %v166_v44 = vpop.f32.mrf.mxu0 }
 0x201   :  { %v4525_v45 = vadd.f32 %v166_v44, %v113_v40 }
 0x202   :  { %v3958_v46 = vpop.f32.mrf.mxu0 }
 0x203   :  { %249 = vrot.lane.b32.xlu1 %v4525_v45, %s4388_s13 }
 0x271   :  { %v172_v47 = vpop.permute.xlu0 %171 }
 0x272   :  { %3960 = vmatpush3.xpose.msk.msra.mxu1 %vm173_vm2, %v172_v47 }
 0x273   :  { %3964 = vmatprep.subr.mxu1 %v4386_v15 }
 0x275   :  { %3962 = vmatmul.mubr.msk.f32.vlgmr.msra.gmra.mxu1 %vm173_vm2, %v4521_v42  ;;  %v250_v48 = vpop.permute.xlu1 %249 }
 0x276   :  { %3965 = vmatpush3.xpose.msk.msra.mxu1 %vm173_vm2, %v250_v48  ;;  %3966 = vmatprep.mubr.msk.f32.mxu1 %vm4387_vm1, %v4386_v15 }
 0x277   :  { %3969 = vmatprep.subr.mxu1 %v4386_v15 }
 0x279   :  { %3967 = vmatmul.mubr.msk.f32.vlgmr.msra.gmra.mxu1 %vm173_vm2, %v4525_v45 }
 0x27a   :  { %3971 = vmatprep.mubr.msk.f32.mxu1 %vm4387_vm1, %v4386_v15 }
 0x335   :  { %v244_v49 = vpop.f32.mrf.mxu1 }
 0x336   :  { %v325_v51 = vmul.f32 0.35355338, %v244_v49 }
 0x337   :  { %v3963_v52 = vpop.f32.mrf.mxu1 }
 0x338   :  { %v339_v53 = vadd.f32 %v4544_v50, %v325_v51 }
 0x339   :  { %v321_v54 = vpop.f32.mrf.mxu1 }
 0x33a   :  { %v326_v56 = vmul.f32 0.35355338, %v321_v54  ;;  %v341_v57 = vsel %vm173_vm2, %v339_v53, -inf }
 0x33b   :  { %342 = vmax.xlane.f32.xlu1 %v341_v57  ;;  %v3968_v58 = vpop.f32.mrf.mxu1 }
 0x33c   :  { %v340_v59 = vadd.f32 %v4550_v55, %v326_v56 }
 0x33e   :  { %v344_v60 = vsel %vm173_vm2, %v340_v59, -inf }
 0x33f   :  { %345 = vmax.xlane.f32.xlu0 %v344_v60 }
 0x34c   :  { %439 = vrot.lane.b32.xlu1 %v4525_v45, %s4389_s18 }
 0x350   :  { %517 = vrot.lane.b32.xlu1 %v4521_v42, %s4390_s19 }
 0x354   :  { %595 = vrot.lane.b32.xlu1 %v4525_v45, %s4390_s19 }
 0x3c4   :  { %v343_v61 = vpop.xlane.xlu1 %342 }
 0x3c5   :  { %v347_v62 = vsub.f32 %v339_v53, %v343_v61 }
 0x3c7   :  { %v349_v63 = vmul.f32 1.442695, %v347_v62 }
 0x3c8   :  { %v346_v0 = vpop.xlane.xlu0 %345  ;;  %v440_v1 = vpop.permute.xlu1 %439 }
 0x3c9   :  { %4274 = vpow2.f32 %v349_v63  ;;  %v348_v2 = vsub.f32 %v340_v59, %v346_v0  ;;  %3975 = vmatpush3.msra.mxu0 %v440_v1 }
 0x3ca   :  { %3984 = vmatprep.subr.mxu0 %v4386_v15 }
 0x3cb   :  { %v351_v3 = vmul.f32 1.442695, %v348_v2 }
 0x3cc   :  { %v518_v8 = vpop.permute.xlu1 %517 }
 0x3cd   :  { %4276 = vpow2.f32 %v351_v3 }
 0x3d0   :  { %v596_v9 = vpop.permute.xlu1 %595 }
 0x3d6   :  { %v4275_v4 = vpop.eup %4274 }
 0x3d7   :  { %v353_v5 = vsel %vm173_vm2, %v4275_v4, 0.0 }
 0x3d8   :  { %354 = vadd.xlane.f32.xlu0 %v353_v5 }
 0x3da   :  { %v4277_v6 = vpop.eup %4276 }
 0x3db   :  { %v356_v7 = vsel %vm173_vm2, %v4277_v6, 0.0 }
 0x3dc   :  { %357 = vadd.xlane.f32.xlu1 %v356_v7 }
 0x3ed   :  { %593 = vrot.lane.b32.xlu1 %v4525_v45, %s4391_s20 }
 0x3ee   :  { %363 = vrot.lane.b32.xlu0 %v4521_v42, %s4389_s18 }
 0x3f2   :  { %515 = vrot.lane.b32.xlu0 %v4521_v42, %s4391_s20 }
 0x461   :  { %v355_v10 = vpop.xlane.xlu0 %354 }
 0x462   :  { %4278 = vrcp.f32 %v355_v10 }
 0x465   :  { %v364_v11 = vpop.permute.xlu0 %363  ;;  %v358_v12 = vpop.xlane.xlu1 %357 }
 0x466   :  { %4280 = vrcp.f32 %v358_v12  ;;  %3970 = vmatpush3.msra.mxu1 %v364_v11 }
 0x467   :  { %3979 = vmatprep.subr.mxu1 %v4386_v15 }
 0x469   :  { %v516_v18 = vpop.permute.xlu0 %515  ;;  %v594_v19 = vpop.permute.xlu1 %593 }
 0x46f   :  { %v4279_v13 = vpop.eup %4278 }
 0x470   :  { %v361_v14 = vmul.f32 %v4279_v13, %v4275_v4 }
 0x472   :  { %3972 = vmatmul.mubr.msk.f32.vlgmr.msra.gmra.mxu1 %vm173_vm2, %v361_v14 }
 0x473   :  { %v4281_v16 = vpop.eup %4280  ;;  %3980 = vmatpush3.xpose.msk.msra.mxu1 %vm173_vm2, %v518_v8  ;;  %3981 = vmatprep.mubr.msk.f32.mxu1 %vm4387_vm1, %v4386_v15 }
 0x474   :  { %v362_v17 = vmul.f32 %v4281_v16, %v4277_v6  ;;  %3989 = vmatprep.subr.mxu1 %v4386_v15 }
 0x476   :  { %3977 = vmatmul.mubr.msk.f32.vlgmr.msra.gmra.mxu0 %vm173_vm2, %v362_v17  ;;  %3982 = vmatmul.mubr.msk.f32.vlgmr.msra.gmra.mxu1 %vm173_vm2, %v516_v18 }
 0x477   :  { %3985 = vmatpush3.xpose.msk.msra.mxu0 %vm173_vm2, %v596_v9  ;;  %3986 = vmatprep.mubr.msk.f32.mxu0 %vm4387_vm1, %v4386_v15 }
 0x478   :  { %3994 = vmatprep.subr.mxu0 %v4386_v15  ;;  %3991 = vmatprep.mubr.msk.f32.mxu1 %vm4387_vm1, %v4386_v15 }
 0x47a   :  { %3987 = vmatmul.mubr.msk.f32.vlgmr.msra.gmra.mxu0 %vm173_vm2, %v594_v19 }
 0x47b   :  { %3996 = vmatprep.mubr.msk.f32.mxu0 %vm4387_vm1, %v4386_v15 }
 0x532   :  { %v4587_v20 = vpop.f32.mrf.mxu1 }
 0x534   :  { %v3973_v21 = vpop.f32.mrf.mxu1 }
 0x536   :  { %v4589_v22 = vpop.f32.mrf.mxu0  ;;  %v589_v23 = vpop.f32.mrf.mxu1 }
 0x537   :  { %v671_v26 = vmul.f32 0.35355338, %v589_v23 }
 0x538   :  { %v3978_v27 = vpop.f32.mrf.mxu0  ;;  %v3983_v28 = vpop.f32.mrf.mxu1 }
 0x539   :  { %v673_v29 = vadd.f32 %v4544_v50, %v671_v26 }
 0x53a   :  { %v667_v31 = vpop.f32.mrf.mxu0 }
 0x53b   :  { %v672_v32 = vmul.f32 0.35355338, %v667_v31  ;;  %v675_v33 = vsel %vm173_vm2, %v673_v29, -inf }
 0x53c   :  { %676 = vmax.xlane.f32.xlu0 %v675_v33  ;;  %v3988_v34 = vpop.f32.mrf.mxu0 }
 0x53d   :  { %v674_v35 = vadd.f32 %v4550_v55, %v672_v32 }
 0x53f   :  { %v678_v38 = vsel %vm173_vm2, %v674_v35, -inf }
 0x540   :  { %679 = vmax.xlane.f32.xlu1 %v678_v38 }
 0x551   :  { %773 = vrot.lane.b32.xlu1 %v4525_v45, %s4392_s21 }
 0x555   :  { %851 = vrot.lane.b32.xlu1 %v4521_v42, %s4393_s22 }
 0x559   :  { %929 = vrot.lane.b32.xlu1 %v4525_v45, %s4393_s22 }
 0x55d   :  { %927 = vrot.lane.b32.xlu1 %v4525_v45, %s4394_s23 }
 0x5c5   :  { %v677_v40 = vpop.xlane.xlu0 %676 }
 0x5c6   :  { %v681_v41 = vsub.f32 %v673_v29, %v677_v40 }
 0x5c8   :  { %v683_v43 = vmul.f32 1.442695, %v681_v41 }
 0x5c9   :  { %v680_v44 = vpop.xlane.xlu1 %679 }
 0x5ca   :  { %4282 = vpow2.f32 %v683_v43  ;;  %v682_v46 = vsub.f32 %v674_v35, %v680_v44 }
 0x5cc   :  { %v685_v47 = vmul.f32 1.442695, %v682_v46 }
 0x5cd   :  { %v774_v48 = vpop.permute.xlu1 %773 }
 0x5ce   :  { %4284 = vpow2.f32 %v685_v47  ;;  %3995 = vmatpush3.msra.mxu0 %v774_v48 }
 0x5cf   :  { %4004 = vmatprep.subr.mxu0 %v4386_v15 }
 0x5d1   :  { %v852_v58 = vpop.permute.xlu1 %851 }
 0x5d5   :  { %v930_v62 = vpop.permute.xlu1 %929 }
 0x5d7   :  { %v4283_v49 = vpop.eup %4282 }
 0x5d8   :  { %v687_v51 = vsel %vm173_vm2, %v4283_v49, 0.0 }
 0x5d9   :  { %688 = vadd.xlane.f32.xlu0 %v687_v51  ;;  %v928_v1 = vpop.permute.xlu1 %927 }
 0x5db   :  { %v4285_v52 = vpop.eup %4284 }
 0x5dc   :  { %v690_v53 = vsel %vm173_vm2, %v4285_v52, 0.0 }
 0x5dd   :  { %691 = vadd.xlane.f32.xlu0 %v690_v53 }
 0x5f3   :  { %697 = vrot.lane.b32.xlu0 %v4521_v42, %s4392_s21 }
 0x5f7   :  { %849 = vrot.lane.b32.xlu0 %v4521_v42, %s4394_s23 }
 0x662   :  { %v689_v54 = vpop.xlane.xlu0 %688 }
 0x663   :  { %4286 = vrcp.f32 %v689_v54 }
 0x666   :  { %v692_v56 = vpop.xlane.xlu0 %691 }
 0x667   :  { %4288 = vrcp.f32 %v692_v56 }
 0x66a   :  { %v698_v57 = vpop.permute.xlu0 %697 }
 0x66b   :  { %3990 = vmatpush3.msra.mxu1 %v698_v57 }
 0x66c   :  { %3999 = vmatprep.subr.mxu1 %v4386_v15 }
 0x66e   :  { %v850_v0 = vpop.permute.xlu0 %849 }
 0x670   :  { %v4287_v59 = vpop.eup %4286 }
 0x671   :  { %v695_v60 = vmul.f32 %v4287_v59, %v4283_v49 }
 0x673   :  { %3992 = vmatmul.mubr.msk.f32.vlgmr.msra.gmra.mxu1 %vm173_vm2, %v695_v60 }
 0x674   :  { %v4289_v61 = vpop.eup %4288  ;;  %4000 = vmatpush3.xpose.msk.msra.mxu1 %vm173_vm2, %v852_v58  ;;  %4001 = vmatprep.mubr.msk.f32.mxu1 %vm4387_vm1, %v4386_v15 }
 0x675   :  { %v696_v63 = vmul.f32 %v4289_v61, %v4285_v52  ;;  %4009 = vmatprep.subr.mxu1 %v4386_v15 }
 0x677   :  { %3997 = vmatmul.mubr.msk.f32.vlgmr.msra.gmra.mxu0 %vm173_vm2, %v696_v63  ;;  %4002 = vmatmul.mubr.msk.f32.vlgmr.msra.gmra.mxu1 %vm173_vm2, %v850_v0 }
 0x678   :  { %4005 = vmatpush3.xpose.msk.msra.mxu0 %vm173_vm2, %v930_v62  ;;  %4006 = vmatprep.mubr.msk.f32.mxu0 %vm4387_vm1, %v4386_v15 }
 0x679   :  { %4014 = vmatprep.subr.mxu0 %v4386_v15  ;;  %4011 = vmatprep.mubr.msk.f32.mxu1 %vm4387_vm1, %v4386_v15 }
 0x67b   :  { %4007 = vmatmul.mubr.msk.f32.vlgmr.msra.gmra.mxu0 %vm173_vm2, %v928_v1 }
 0x67c   :  { %4016 = vmatprep.mubr.msk.f32.mxu0 %vm4387_vm1, %v4386_v15 }
 0x733   :  { %v4627_v2 = vpop.f32.mrf.mxu1 }
 0x735   :  { %v3993_v3 = vpop.f32.mrf.mxu1 }
 0x737   :  { %v4629_v4 = vpop.f32.mrf.mxu0  ;;  %v923_v5 = vpop.f32.mrf.mxu1 }
 0x738   :  { %v4216_v6 = vpack.i.bf16 %v4629_v4, %v4627_v2  ;;  %v1005_v7 = vmul.f32 0.35355338, %v923_v5 }
 0x739   :  { %v3998_v8 = vpop.f32.mrf.mxu0  ;;  %v4003_v9 = vpop.f32.mrf.mxu1 }
 0x73a   :  { %v1007_v10 = vadd.f32 %v4544_v50, %v1005_v7 }
 0x73b   :  { %v1001_v11 = vpop.f32.mrf.mxu0 }
 0x73c   :  { %v1006_v12 = vmul.f32 0.35355338, %v1001_v11  ;;  %v1009_v13 = vsel %vm173_vm2, %v1007_v10, -inf }
 0x73d   :  { %1010 = vmax.xlane.f32.xlu0 %v1009_v13  ;;  %v4008_v14 = vpop.f32.mrf.mxu0 }
 0x73e   :  { %v1008_v16 = vadd.f32 %v4550_v55, %v1006_v12 }
 0x740   :  { %v1012_v17 = vsel %vm173_vm2, %v1008_v16, -inf }
 0x741   :  { %1013 = vmax.xlane.f32.xlu1 %v1012_v17 }
 0x752   :  { %1107 = vrot.lane.b32.xlu1 %v4525_v45, %s4395_s24 }
 0x756   :  { %1185 = vrot.lane.b32.xlu1 %v4521_v42, %s4396_s0 }
 0x75a   :  { %1263 = vrot.lane.b32.xlu1 %v4525_v45, %s4396_s0 }
 0x75e   :  { %1261 = vrot.lane.b32.xlu1 %v4525_v45, %s4397_s25 }
 0x7c6   :  { %v1011_v18 = vpop.xlane.xlu0 %1010 }
 0x7c7   :  { %v1015_v19 = vsub.f32 %v1007_v10, %v1011_v18 }
 0x7c9   :  { %v1017_v21 = vmul.f32 1.442695, %v1015_v19 }
 0x7ca   :  { %v1014_v23 = vpop.xlane.xlu1 %1013 }
 0x7cb   :  { %4290 = vpow2.f32 %v1017_v21  ;;  %v1016_v26 = vsub.f32 %v1008_v16, %v1014_v23  ;;  %v4249_v23 = vld [vmem:[%s5082_s4] sm:$0xff]  }
 0x7cd   :  { %v1019_v27 = vmul.f32 1.442695, %v1016_v26 }
 0x7ce   :  { %v1108_v28 = vpop.permute.xlu1 %1107 }
 0x7cf   :  { %4292 = vpow2.f32 %v1019_v27  ;;  %4015 = vmatpush3.msra.mxu0 %v1108_v28 }
 0x7d0   :  { %4024 = vmatprep.subr.mxu0 %v4386_v15 }
 0x7d2   :  { %v1186_v40 = vpop.permute.xlu1 %1185 }
 0x7d6   :  { %v1264_v46 = vpop.permute.xlu1 %1263 }
 0x7d8   :  { %v4291_v29 = vpop.eup %4290 }
 0x7d9   :  { %v1021_v31 = vsel %vm173_vm2, %v4291_v29, 0.0 }
 0x7da   :  { %1022 = vadd.xlane.f32.xlu0 %v1021_v31  ;;  %v1262_v49 = vpop.permute.xlu1 %1261 }
 0x7dc   :  { %v4293_v32 = vpop.eup %4292 }
 0x7dd   :  { %v1024_v33 = vsel %vm173_vm2, %v4293_v32, 0.0 }
 0x7de   :  { %1025 = vadd.xlane.f32.xlu0 %v1024_v33 }
 0x7f4   :  { %1031 = vrot.lane.b32.xlu0 %v4521_v42, %s4395_s24 }
 0x7f8   :  { %1183 = vrot.lane.b32.xlu0 %v4521_v42, %s4397_s25 }
 0x863   :  { %v1023_v34 = vpop.xlane.xlu0 %1022 }
 0x864   :  { %4294 = vrcp.f32 %v1023_v34 }
 0x867   :  { %v1026_v35 = vpop.xlane.xlu0 %1025 }
 0x868   :  { %4296 = vrcp.f32 %v1026_v35 }
 0x86b   :  { %v1032_v38 = vpop.permute.xlu0 %1031 }
 0x86c   :  { %4010 = vmatpush3.msra.mxu1 %v1032_v38 }
 0x86d   :  { %4019 = vmatprep.subr.mxu1 %v4386_v15 }
 0x86f   :  { %v1184_v48 = vpop.permute.xlu0 %1183 }
 0x871   :  { %v4295_v41 = vpop.eup %4294 }
 0x872   :  { %v1029_v43 = vmul.f32 %v4295_v41, %v4291_v29 }
 0x874   :  { %4012 = vmatmul.mubr.msk.f32.vlgmr.msra.gmra.mxu1 %vm173_vm2, %v1029_v43 }
 0x875   :  { %v4297_v44 = vpop.eup %4296  ;;  %4020 = vmatpush3.xpose.msk.msra.mxu1 %vm173_vm2, %v1186_v40  ;;  %4021 = vmatprep.mubr.msk.f32.mxu1 %vm4387_vm1, %v4386_v15 }
 0x876   :  { %v1030_v47 = vmul.f32 %v4297_v44, %v4293_v32  ;;  %4029 = vmatprep.subr.mxu1 %v4386_v15 }
 0x878   :  { %4017 = vmatmul.mubr.msk.f32.vlgmr.msra.gmra.mxu0 %vm173_vm2, %v1030_v47  ;;  %4022 = vmatmul.mubr.msk.f32.vlgmr.msra.gmra.mxu1 %vm173_vm2, %v1184_v48 }
 0x879   :  { %4025 = vmatpush3.xpose.msk.msra.mxu0 %vm173_vm2, %v1264_v46  ;;  %4026 = vmatprep.mubr.msk.f32.mxu0 %vm4387_vm1, %v4386_v15 }
 0x87a   :  { %4034 = vmatprep.subr.mxu0 %v4386_v15  ;;  %4031 = vmatprep.mubr.msk.f32.mxu1 %vm4387_vm1, %v4386_v15 }
 0x87c   :  { %4027 = vmatmul.mubr.msk.f32.vlgmr.msra.gmra.mxu0 %vm173_vm2, %v1262_v49 }
 0x87d   :  { %4036 = vmatprep.mubr.msk.f32.mxu0 %vm4387_vm1, %v4386_v15 }
 0x934   :  { %v1103_v51 = vpop.f32.mrf.mxu1 }
 0x936   :  { %v4013_v52 = vpop.f32.mrf.mxu1 }
 0x938   :  { %v1179_v53 = vpop.f32.mrf.mxu0  ;;  %v1257_v54 = vpop.f32.mrf.mxu1 }
 0x939   :  { %v1339_v56 = vmul.f32 0.35355338, %v1257_v54  ;;  %v4221_v3 = vpack.i.bf16 %v1179_v53, %v1103_v51 }
 0x93a   :  { %v4018_v57 = vpop.f32.mrf.mxu0  ;;  %v4023_v58 = vpop.f32.mrf.mxu1 }
 0x93b   :  { %v1341_v59 = vadd.f32 %v4544_v50, %v1339_v56 }
 0x93c   :  { %v1335_v60 = vpop.f32.mrf.mxu0 }
 0x93d   :  { %v1340_v61 = vmul.f32 0.35355338, %v1335_v60  ;;  %v1343_v62 = vsel %vm173_vm2, %v1341_v59, -inf }
 0x93e   :  { %1344 = vmax.xlane.f32.xlu0 %v1343_v62  ;;  %v4028_v63 = vpop.f32.mrf.mxu0 }
 0x93f   :  { %v1342_v0 = vadd.f32 %v4550_v55, %v1340_v61 }
 0x941   :  { %v1346_v1 = vsel %vm173_vm2, %v1342_v0, -inf }
 0x942   :  { %1347 = vmax.xlane.f32.xlu1 %v1346_v1 }
 0x953   :  { %1441 = vrot.lane.b32.xlu1 %v4525_v45, %s4398_s26 }
 0x957   :  { %4217 = vrot.lane.b32.xlu1 %v4216_v6, %s4399_s27 }
 0x95b   :  { %4222 = vrot.lane.b32.xlu1 %v4221_v3, %s4400_s28 }
 0x9c7   :  { %v1345_v5 = vpop.xlane.xlu0 %1344 }
 0x9c8   :  { %v1349_v7 = vsub.f32 %v1341_v59, %v1345_v5 }
 0x9ca   :  { %v1351_v8 = vmul.f32 1.442695, %v1349_v7 }
 0x9cb   :  { %v1348_v9 = vpop.xlane.xlu1 %1347 }
 0x9cc   :  { %4298 = vpow2.f32 %v1351_v8  ;;  %v1350_v10 = vsub.f32 %v1342_v0, %v1348_v9 }
 0x9ce   :  { %v1353_v11 = vmul.f32 1.442695, %v1350_v10 }
 0x9cf   :  { %v1442_v12 = vpop.permute.xlu1 %1441 }
 0x9d0   :  { %4300 = vpow2.f32 %v1353_v11  ;;  %4035 = vmatpush3.msra.mxu0 %v1442_v12  ;;  %v4251_v12 = vld [vmem:[%s5083_s5] sm:$0xff]  }
 0x9d1   :  { %4047 = vmatprep.subr.bf16.mxu0 %v4386_v15 }
 0x9d3   :  { %v4218_v32 = vpop.permute.xlu1 %4217 }
 0x9d4   :  { %v4220_v34 = vunpack.i.h.bf16 %v4218_v32  ;;  %v4219_v35 = vunpack.i.l.bf16 %v4218_v32 }
 0x9d6   :  { %v1542_v43 = vsel %vm173_vm2, %v4589_v22, %v4220_v34  ;;  %v1541_v44 = vsel %vm173_vm2, %v4587_v20, %v4219_v35  ;;  %v1553_v22 = vrot.slane %v4517_v39, %v4502_v30  ;;  %v4253_v34 = vld [vmem:[%s5084_s6 + $0x10] sm:$0xff]   ;;  %v4254_v35 = vld [vmem:[%s5084_s6 + $0x8] sm:$0xff]  }
 0x9d7   :  { %v4223_v33 = vpop.permute.xlu1 %4222 }
 0x9d8   :  { %v4225_v38 = vunpack.i.h.bf16 %v4223_v33  ;;  %v4224_v40 = vunpack.i.l.bf16 %v4223_v33  ;;  %v4252_v33 = vld [vmem:[%s5084_s6 + $0x18] sm:$0xff]  }
 0x9d9   :  { %v4299_v45 = vpop.eup %4298 }
 0x9da   :  { %v1355_v2 = vsel %vm173_vm2, %v4299_v45, 0.0  ;;  %v1544_v48 = vsel %vm1543_vm3, %v1541_v44, %v4224_v40  ;;  %v1545_v49 = vsel %vm1543_vm3, %v1542_v43, %v4225_v38  ;;  %v4255_v38 = vld [vmem:[%s5084_s6] sm:$0xff]   ;;  %v1653_v40 = vsub.s32 4, %v4492_v24 }
 0x9db   :  { %1356 = vadd.xlane.f32.xlu0 %v1355_v2 }
 0x9dd   :  { %v4301_v4 = vpop.eup %4300 }
 0x9de   :  { %v1358_v6 = vsel %vm173_vm2, %v4301_v4, 0.0 }
 0x9df   :  { %1359 = vadd.xlane.f32.xlu0 %v1358_v6 }
 0x9f5   :  { %1365 = vrot.lane.b32.xlu0 %v4521_v42, %s4398_s26  ;;  %v4248_v42 = vld [vmem:[%s5082_s4 + $0x8] sm:$0xff]  }
 0xa64   :  { %v1357_v13 = vpop.xlane.xlu0 %1356 }
 0xa65   :  { %4302 = vrcp.f32 %v1357_v13 }
 0xa68   :  { %v1360_v14 = vpop.xlane.xlu0 %1359 }
 0xa69   :  { %4304 = vrcp.f32 %v1360_v14 }
 0xa6c   :  { %v1366_v16 = vpop.permute.xlu0 %1365 }
 0xa6d   :  { %4030 = vmatpush3.msra.mxu1 %v1366_v16  ;;  %v1640_v16 = vsub.s32 2, %v4492_v24 }
 0xa6e   :  { %4039 = vmatprep.subr.bf16.mxu1 %v4386_v15 }
 0xa72   :  { %v4303_v17 = vpop.eup %4302 }
 0xa73   :  { %v1363_v18 = vmul.f32 %v4303_v17, %v4299_v45 }
 0xa75   :  { %4032 = vmatmul.mubr.msk.f32.vlgmr.msra.gmra.mxu1 %vm173_vm2, %v1363_v18 }
 0xa76   :  { %v4305_v19 = vpop.eup %4304  ;;  %4043 = vmatprep.mubr.msk.bf16.mxu1 %vm4387_vm1, %v4386_v15  ;;  %4040 = vmatpush3.bf16.msra.mxu1 %v4248_v42 }
 0xa77   :  { %v1364_v21 = vmul.f32 %v4305_v19, %v4301_v4  ;;  %4041 = vmatprep.subr.bf16.mxu1 %v4386_v15  ;;  %v1641_v19 = vrot.slane %v4517_v39, %v1640_v16 }
 0xa79   :  { %4037 = vmatmul.mubr.msk.f32.vlgmr.msra.gmra.mxu0 %vm173_vm2, %v1364_v21  ;;  %v1646_v21 = vsub.s32 3, %v4492_v24 }
 0xa7a   :  { %4051 = vmatprep.mubr.msk.bf16.mxu0 %vm4387_vm1, %v4386_v15  ;;  %4042 = vmatpush3.bf16.msra.mxu1 %v4249_v23 }
 0xa7b   :  { %4055 = vmatprep.subr.bf16.mxu1 %v4386_v15 }
 0xb35   :  { %v1437_v26 = vpop.f32.mrf.mxu1 }
 0xb37   :  { %v4033_v27 = vpop.f32.mrf.mxu1 }
 0xb38   :  { %v1647_v27 = vrot.slane %v4517_v39, %v1646_v21 }
 0xb39   :  { %v1513_v28 = vpop.f32.mrf.mxu0 }
 0xb3a   :  { %v4226_v29 = vpack.i.bf16 %v1513_v28, %v1437_v26 }
 0xb3b   :  { %v4038_v31 = vpop.f32.mrf.mxu0 }
 0xb3c   :  { %4227 = vrot.lane.b32.xlu0 %v4226_v29, %s5091_s15 }
 0xbae   :  { %v4228_v41 = vpop.permute.xlu0 %4227 }
 0xbaf   :  { %v4230_v46 = vunpack.i.h.bf16 %v4228_v41  ;;  %v4229_v47 = vunpack.i.l.bf16 %v4228_v41  ;;  %v1654_v41 = vrot.slane %v4517_v39, %v1653_v40 }
 0xbb1   :  { %v1548_v51 = vsel %vm1546_vm4, %v1545_v49, %v4230_v46  ;;  %v1547_v52 = vsel %vm1546_vm4, %v1544_v48, %v4229_v47 }
 0xbb2   :  { %v1549_v53 = vpack.c.bf16 %v1548_v51, %v1547_v52 }
 0xbb4   :  { %4044 = vmatmul.mubr.msk.bf16.vlgmr.msra.gmra.mxu1 %vm46_vm0, %v1549_v53 }
 0xbb5   :  { %4063 = vmatprep.mubr.msk.bf16.mxu1 %vm4387_vm1, %v4386_v15  ;;  %4056 = vmatpush3.bf16.msra.mxu1 %v4252_v33 }
 0xbb6   :  { %4057 = vmatprep.subr.bf16.mxu1 %v4386_v15 }
 0xbb9   :  { %4058 = vmatpush3.bf16.msra.mxu1 %v4253_v34 }
 0xbba   :  { %4059 = vmatprep.subr.bf16.mxu1 %v4386_v15 }
 0xbbd   :  { %4060 = vmatpush3.bf16.msra.mxu1 %v4254_v35 }
 0xbbe   :  { %4061 = vmatprep.subr.bf16.mxu1 %v4386_v15 }
 0xbc1   :  { %4062 = vmatpush3.bf16.msra.mxu1 %v4255_v38 }
 0xbc2   :  { %4085 = vmatprep.subr.mxu1 %v4386_v15 }
 0xc74   :  { %v1603_v20 = vpop.f32.mrf.mxu1 }
 0xc75   :  { %v1604_v54 = vadd.f32 %v1603_v20, %v1553_v22 }
 0xc76   :  { %v4045_v56 = vpop.f32.mrf.mxu1 }
 0xc77   :  { %v1610_v57 = vadd.f32 %v1604_v54, %v4505_v36 }
 0xc78   :  { %v1606_v58 = vpop.f32.mrf.mxu1 }
 0xc79   :  { %v1607_v59 = vadd.f32 %v1606_v58, %v1553_v22  ;;  %v1612_v60 = vsel %vm46_vm0, %v1610_v57, 0.0 }
 0xc7a   :  { %1613 = vadd.xlane.f32.xlu1 %v1612_v60  ;;  %v4046_v61 = vpop.f32.mrf.mxu1 }
 0xc7b   :  { %v1611_v62 = vadd.f32 %v1607_v59, %v4507_v37  ;;  %v4250_v37 = vld [vmem:[%s5083_s5 + $0x8] sm:$0xff]  }
 0xc7c   :  { %4048 = vmatpush3.bf16.msra.mxu0 %v4250_v37 }
 0xc7d   :  { %v1615_v63 = vsel %vm46_vm0, %v1611_v62, 0.0  ;;  %4049 = vmatprep.subr.bf16.mxu0 %v4386_v15 }
 0xc7e   :  { %1616 = vadd.xlane.f32.xlu0 %v1615_v63 }
 0xc80   :  { %4050 = vmatpush3.bf16.msra.mxu0 %v4251_v12 }
 0xc81   :  { %4067 = vmatprep.subr.bf16.mxu0 %v4386_v15 }
 0xd03   :  { %v1614_v0 = vpop.xlane.xlu1 %1613 }
 0xd04   :  { %v1618_v1 = vmul.f32 0.03125, %v1614_v0 }
 0xd06   :  { %v1620_v3 = vsub.f32 %v1610_v57, %v1618_v1 }
 0xd07   :  { %v1617_v5 = vpop.xlane.xlu0 %1616 }
 0xd08   :  { %v1619_v7 = vmul.f32 0.03125, %v1617_v5  ;;  %v1622_v8 = vmul.f32 %v1620_v3, %v1620_v3 }
 0xd0a   :  { %v1621_v9 = vsub.f32 %v1611_v62, %v1619_v7  ;;  %v1624_v36 = vsel %vm46_vm0, %v1622_v8, 0.0  ;;  %v1732_v8 = vsub.s32 5, %v4492_v24 }
 0xd0b   :  { %1625 = vadd.xlane.f32.xlu0 %v1624_v36 }
 0xd0c   :  { %v1623_v10 = vmul.f32 %v1621_v9, %v1621_v9 }
 0xd0e   :  { %v1627_v11 = vsel %vm46_vm0, %v1623_v10, 0.0 }
 0xd0f   :  { %1628 = vadd.xlane.f32.xlu0 %v1627_v11 }
 0xd94   :  { %v1626_v45 = vpop.xlane.xlu0 %1625 }
 0xd95   :  { %v1630_v2 = vmul.f32 0.03125, %v1626_v45 }
 0xd97   :  { %v1632_v4 = vadd.f32 1e-12, %v1630_v2 }
 0xd98   :  { %v1629_v6 = vpop.xlane.xlu0 %1628 }
 0xd99   :  { %4306 = vrsqrt.f32 %v1632_v4  ;;  %v1631_v13 = vmul.f32 0.03125, %v1629_v6 }
 0xd9b   :  { %v1633_v14 = vadd.f32 1e-12, %v1631_v13 }
 0xd9d   :  { %4308 = vrsqrt.f32 %v1633_v14 }
 0xda6   :  { %v4307_v17 = vpop.eup %4306 }
 0xda7   :  { %v1636_v18 = vmul.f32 %v4307_v17, %v1620_v3 }
 0xda9   :  { %v1642_v26 = vmul.f32 %v1641_v19, %v1636_v18 }
 0xdaa   :  { %v4309_v42 = vpop.eup %4308 }
 0xdab   :  { %v1637_v23 = vmul.f32 %v4309_v42, %v1621_v9  ;;  %v1648_v29 = vadd.f32 %v1647_v27, %v1642_v26  ;;  %v1733_v9 = vrot.slane %v4517_v39, %v1732_v8 }
 0xdad   :  { %v1643_v28 = vmul.f32 %v1641_v19, %v1637_v23 }
 0xdaf   :  { %v1649_v31 = vadd.f32 %v1647_v27, %v1643_v28 }
 0xdb1   :  { %v1650_v32 = vpack.c.bf16 %v1649_v31, %v1648_v29 }
 0xdb3   :  { %4052 = vmatmul.mubr.msk.bf16.vlgmr.msra.gmra.mxu0 %vm46_vm0, %v1650_v32  ;;  %v4257_v32 = vld [vmem:[%s5081_s3 + $0x10] sm:$0xff]  }
 0xdb4   :  { %4071 = vmatprep.mubr.msk.bf16.mxu0 %vm4387_vm1, %v4386_v15 }
 0xe73   :  { %v1704_v43 = vpop.f32.mrf.mxu0 }
 0xe74   :  { %v1705_v44 = vadd.f32 %v1704_v43, %v1654_v41 }
 0xe75   :  { %v4053_v46 = vpop.f32.mrf.mxu0 }
 0xe76   :  { %v1711_v47 = vmul.f32 %v1705_v44, %v1705_v44 }
 0xe77   :  { %v1707_v48 = vpop.f32.mrf.mxu0 }
 0xe78   :  { %v1713_v49 = vmul.f32 %v1711_v47, %v1705_v44  ;;  %v1708_v51 = vadd.f32 %v1707_v48, %v1654_v41 }
 0xe79   :  { %v4054_v52 = vpop.f32.mrf.mxu0 }
 0xe7a   :  { %v1715_v53 = vmul.f32 0.044715, %v1713_v49  ;;  %v1712_v22 = vmul.f32 %v1708_v51, %v1708_v51  ;;  %v1839_v49 = vsub.s32 7, %v4492_v24 }
 0xe7c   :  { %v1717_v20 = vadd.f32 %v1715_v53, %v1705_v44  ;;  %v1714_v54 = vmul.f32 %v1712_v22, %v1708_v51  ;;  %v1840_v22 = vrot.slane %v4517_v39, %v1839_v49 }
 0xe7e   :  { %v1719_v56 = vmul.f32 0.7978846, %v1717_v20  ;;  %v1716_v57 = vmul.f32 0.044715, %v1714_v54 }
 0xe80   :  { %4310 = vtanh.f32 %v1719_v56  ;;  %v1718_v58 = vadd.f32 %v1716_v57, %v1708_v51 }
 0xe82   :  { %v1720_v59 = vmul.f32 0.7978846, %v1718_v58  ;;  %v4798_v58 = vld [vmem:[%s5085_s7 + $0x8] sm:$0xff] }
 0xe84   :  { %4312 = vtanh.f32 %v1720_v59 }
 0xe8d   :  { %v4311_v60 = vpop.eup %4310 }
 0xe8e   :  { %v1723_v61 = vadd.f32 1.0, %v4311_v60 }
 0xe90   :  { %v1725_v63 = vmul.f32 0.5, %v1723_v61 }
 0xe91   :  { %v4313_v62 = vpop.eup %4312 }
 0xe92   :  { %v1724_v0 = vadd.f32 1.0, %v4313_v62  ;;  %v1727_v3 = vmul.f32 %v1725_v63, %v1705_v44  ;;  %v1833_v44 = vsub.s32 6, %v4492_v24  ;;  %v4268_v24 = vld [vmem:[%s5088_s10 + $0x8] sm:$0xff]  }
 0xe94   :  { %v1726_v1 = vmul.f32 0.5, %v1724_v0  ;;  %v1834_v48 = vrot.slane %v4517_v39, %v1833_v44  ;;  %v1873_v39 = vrot.slane %v4798_v58, %v4495_v25 }
 0xe96   :  { %v1728_v5 = vmul.f32 %v1726_v1, %v1708_v51 }
 0xe98   :  { %v1729_v7 = vpack.c.bf16 %v1728_v5, %v1727_v3 }
 0xe9a   :  { %4064 = vmatmul.mubr.msk.bf16.vlgmr.msra.gmra.mxu1 %vm1758_vm5, %v1729_v7 }
 0xe9b   :  { %4087 = vmatprep.mubr.msk.f32.mxu1 %vm4387_vm1, %v4386_v15 }
 0xf5a   :  { %v1796_v36 = vpop.f32.mrf.mxu1 }
 0xf5b   :  { %v1797_v10 = vadd.f32 %v1796_v36, %v1733_v9 }
 0xf5c   :  { %v4065_v11 = vpop.f32.mrf.mxu1 }
 0xf5d   :  { %v1803_v37 = vadd.f32 %v1797_v10, %v1648_v29 }
 0xf5e   :  { %v1799_v12 = vpop.f32.mrf.mxu1 }
 0xf5f   :  { %v1800_v45 = vadd.f32 %v1799_v12, %v1733_v9  ;;  %v1805_v2 = vsel %vm46_vm0, %v1803_v37, 0.0 }
 0xf60   :  { %1806 = vadd.xlane.f32.xlu1 %v1805_v2  ;;  %v4066_v4 = vpop.f32.mrf.mxu1 }
 0xf61   :  { %v1804_v6 = vadd.f32 %v1800_v45, %v1649_v31  ;;  %v4256_v31 = vld [vmem:[%s5081_s3 + $0x18] sm:$0xff]  }
 0xf62   :  { %4068 = vmatpush3.bf16.msra.mxu0 %v4256_v31 }
 0xf63   :  { %v1808_v13 = vsel %vm46_vm0, %v1804_v6, 0.0  ;;  %4069 = vmatprep.subr.bf16.mxu0 %v4386_v15 }
 0xf64   :  { %1809 = vadd.xlane.f32.xlu0 %v1808_v13 }
 0xf66   :  { %4070 = vmatpush3.bf16.msra.mxu0 %v4257_v32 }
 0xf67   :  { %4075 = vmatprep.subr.mxu0 %v4386_v15 }
 0xfe9   :  { %v1807_v14 = vpop.xlane.xlu1 %1806 }
 0xfea   :  { %v1811_v17 = vmul.f32 0.03125, %v1807_v14 }
 0xfec   :  { %v1813_v18 = vsub.f32 %v1803_v37, %v1811_v17 }
 0xfed   :  { %v1810_v19 = vpop.xlane.xlu0 %1809 }
 0xfee   :  { %v1812_v42 = vmul.f32 0.03125, %v1810_v19  ;;  %v1815_v23 = vmul.f32 %v1813_v18, %v1813_v18 }
 0xff0   :  { %v1814_v26 = vsub.f32 %v1804_v6, %v1812_v42  ;;  %v1817_v27 = vsel %vm46_vm0, %v1815_v23, 0.0 }
 0xff1   :  { %1818 = vadd.xlane.f32.xlu1 %v1817_v27 }
 0xff2   :  { %v1816_v28 = vmul.f32 %v1814_v26, %v1814_v26 }
 0xff4   :  { %v1820_v29 = vsel %vm46_vm0, %v1816_v28, 0.0 }
 0xff5   :  { %1821 = vadd.xlane.f32.xlu0 %v1820_v29 }
0x107a   :  { %v1819_v33 = vpop.xlane.xlu1 %1818 }
0x107b   :  { %v1823_v34 = vmul.f32 0.03125, %v1819_v33 }
0x107d   :  { %v1825_v35 = vadd.f32 1e-12, %v1823_v34 }
0x107e   :  { %v1822_v38 = vpop.xlane.xlu0 %1821 }
0x107f   :  { %4314 = vrsqrt.f32 %v1825_v35  ;;  %v1824_v41 = vmul.f32 0.03125, %v1822_v38 }
0x1081   :  { %v1826_v43 = vadd.f32 1e-12, %v1824_v41 }
0x1083   :  { %4316 = vrsqrt.f32 %v1826_v43 }
0x108c   :  { %v4315_v46 = vpop.eup %4314 }
0x108d   :  { %v1829_v47 = vmul.f32 %v4315_v46, %v1813_v18 }
0x108f   :  { %v1835_v53 = vmul.f32 %v1834_v48, %v1829_v47 }
0x1090   :  { %v4317_v51 = vpop.eup %4316 }
0x1091   :  { %v1830_v52 = vmul.f32 %v4317_v51, %v1814_v26  ;;  %v4786_v54 = vadd.f32 %v1840_v22, %v1835_v53  ;;  %v4865_v53 = vld [vmem:[%s5079_s1] ss:$0 sm:$0xff] }
0x1093   :  { %v1836_v20 = vmul.f32 %v1834_v48, %v1830_v52 }
0x1095   :  { %v4788_v56 = vadd.f32 %v1840_v22, %v1836_v20 }
0x1097   :  { %v1869_v57 = vpack.c.bf16 %v4788_v56, %v4786_v54 }
0x1099   :  { %4072 = vmatmul.mubr.msk.bf16.vlgmr.msra.gmra.mxu0 %vm46_vm0, %v1869_v57 }
0x109a   :  { %4077 = vmatprep.mubr.msk.f32.mxu0 %vm4387_vm1, %v4386_v15 }
0x1159   :  { %v1923_v59 = vpop.f32.mrf.mxu0 }
0x115a   :  { %v4802_v60 = vadd.f32 %v1923_v59, %v1873_v39 }
0x115b   :  { %v4073_v61 = vpop.f32.mrf.mxu0 }
0x115c   :  { %1931 = vrot.lane.b32.xlu1 %v4802_v60, %s4388_s13  ;;  %v4872_v61 = vld [vmem:[%s5079_s1 + $0x1] ss:$0 sm:$0xff] }
0x115d   :  { %v1926_v62 = vpop.f32.mrf.mxu0 }
0x115e   :  { %v4806_v63 = vadd.f32 %v1926_v62, %v1873_v39 }
0x115f   :  { %v4074_v0 = vpop.f32.mrf.mxu0 }
0x1160   :  { %2008 = vrot.lane.b32.xlu0 %v4806_v63, %s4388_s13 }
0x11ce   :  { %v1932_v1 = vpop.permute.xlu1 %1931 }
0x11cf   :  { %4076 = vmatpush3.xpose.msk.msra.mxu0 %vm173_vm2, %v1932_v1 }
0x11d0   :  { %4080 = vmatprep.subr.mxu0 %v4386_v15 }
0x11d2   :  { %4078 = vmatmul.mubr.msk.f32.vlgmr.msra.gmra.mxu0 %vm173_vm2, %v4802_v60  ;;  %v2009_v25 = vpop.permute.xlu0 %2008 }
0x11d3   :  { %4081 = vmatpush3.xpose.msk.msra.mxu0 %vm173_vm2, %v2009_v25  ;;  %4082 = vmatprep.mubr.msk.f32.mxu0 %vm4387_vm1, %v4386_v15 }
0x11d4   :  { %4090 = vmatprep.subr.mxu0 %v4386_v15 }
0x11d6   :  { %4083 = vmatmul.mubr.msk.f32.vlgmr.msra.gmra.mxu0 %vm173_vm2, %v4806_v63 }
0x11d7   :  { %4092 = vmatprep.mubr.msk.f32.mxu0 %vm4387_vm1, %v4386_v15 }
0x1292   :  { %v2003_v3 = vpop.f32.mrf.mxu0 }
0x1293   :  { %v2084_v5 = vmul.f32 0.35355338, %v2003_v3 }
0x1294   :  { %v4079_v7 = vpop.f32.mrf.mxu0 }
0x1295   :  { %v2086_v9 = vadd.f32 %v4544_v50, %v2084_v5 }
0x1296   :  { %v2080_v36 = vpop.f32.mrf.mxu0 }
0x1297   :  { %v2085_v10 = vmul.f32 0.35355338, %v2080_v36  ;;  %v2088_v11 = vsel %vm173_vm2, %v2086_v9, -inf }
0x1298   :  { %2089 = vmax.xlane.f32.xlu1 %v2088_v11  ;;  %v4084_v37 = vpop.f32.mrf.mxu0 }
0x1299   :  { %v2087_v12 = vadd.f32 %v4550_v55, %v2085_v10 }
0x129b   :  { %v2091_v45 = vsel %vm173_vm2, %v2087_v12, -inf }
0x129c   :  { %2092 = vmax.xlane.f32.xlu0 %v2091_v45 }
0x12a9   :  { %2110 = vrot.lane.b32.xlu1 %v4802_v60, %s4389_s18 }
0x1321   :  { %v2090_v2 = vpop.xlane.xlu1 %2089 }
0x1322   :  { %v2094_v4 = vsub.f32 %v2086_v9, %v2090_v2 }
0x1324   :  { %v2096_v6 = vmul.f32 1.442695, %v2094_v4 }
0x1325   :  { %v2111_v13 = vpop.permute.xlu1 %2110  ;;  %v2093_v14 = vpop.xlane.xlu0 %2092 }
0x1326   :  { %4318 = vpow2.f32 %v2096_v6  ;;  %v2095_v50 = vsub.f32 %v2087_v12, %v2093_v14  ;;  %4086 = vmatpush3.msra.mxu1 %v2111_v13 }
0x1327   :  { %4095 = vmatprep.subr.mxu1 %v4386_v15 }
0x1328   :  { %v2098_v17 = vmul.f32 1.442695, %v2095_v50 }
0x132a   :  { %4320 = vpow2.f32 %v2098_v17 }
0x1333   :  { %v4319_v18 = vpop.eup %4318 }
0x1334   :  { %v2100_v55 = vsel %vm173_vm2, %v4319_v18, 0.0 }
0x1335   :  { %2101 = vadd.xlane.f32.xlu1 %v2100_v55 }
0x1337   :  { %v4321_v19 = vpop.eup %4320 }
0x1338   :  { %v2103_v42 = vsel %vm173_vm2, %v4321_v19, 0.0 }
0x1339   :  { %2104 = vadd.xlane.f32.xlu0 %v2103_v42 }
0x1346   :  { %2264 = vrot.lane.b32.xlu1 %v4802_v60, %s4390_s19 }
0x134a   :  { %2342 = vrot.lane.b32.xlu1 %v4806_v63, %s4390_s19 }
0x134e   :  { %2262 = vrot.lane.b32.xlu1 %v4802_v60, %s4391_s20 }
0x134f   :  { %2186 = vrot.lane.b32.xlu0 %v4806_v63, %s4389_s18 }
0x1353   :  { %2340 = vrot.lane.b32.xlu0 %v4806_v63, %s4391_s20 }
0x13be   :  { %v2102_v23 = vpop.xlane.xlu1 %2101 }
0x13bf   :  { %4322 = vrcp.f32 %v2102_v23 }
0x13c2   :  { %v2105_v26 = vpop.xlane.xlu0 %2104  ;;  %v2265_v27 = vpop.permute.xlu1 %2264 }
0x13c3   :  { %4324 = vrcp.f32 %v2105_v26 }
0x13c6   :  { %v2187_v28 = vpop.permute.xlu0 %2186  ;;  %v2343_v31 = vpop.permute.xlu1 %2342 }
0x13c7   :  { %4091 = vmatpush3.msra.mxu0 %v2187_v28 }
0x13c8   :  { %4100 = vmatprep.subr.mxu0 %v4386_v15 }
0x13ca   :  { %v2263_v35 = vpop.permute.xlu1 %2262  ;;  %v2341_v38 = vpop.permute.xlu0 %2340 }
0x13cc   :  { %v4323_v29 = vpop.eup %4322 }
0x13cd   :  { %v2108_v32 = vmul.f32 %v4323_v29, %v4319_v18 }
0x13cf   :  { %4088 = vmatmul.mubr.msk.f32.vlgmr.msra.gmra.mxu1 %vm173_vm2, %v2108_v32 }
0x13d0   :  { %v4325_v33 = vpop.eup %4324  ;;  %4096 = vmatpush3.xpose.msk.msra.mxu1 %vm173_vm2, %v2265_v27  ;;  %4097 = vmatprep.mubr.msk.f32.mxu1 %vm4387_vm1, %v4386_v15 }
0x13d1   :  { %v2109_v34 = vmul.f32 %v4325_v33, %v4321_v19  ;;  %4105 = vmatprep.subr.mxu1 %v4386_v15 }
0x13d3   :  { %4093 = vmatmul.mubr.msk.f32.vlgmr.msra.gmra.mxu0 %vm173_vm2, %v2109_v34  ;;  %4098 = vmatmul.mubr.msk.f32.vlgmr.msra.gmra.mxu1 %vm173_vm2, %v2263_v35 }
0x13d4   :  { %4101 = vmatpush3.xpose.msk.msra.mxu0 %vm173_vm2, %v2343_v31  ;;  %4102 = vmatprep.mubr.msk.f32.mxu0 %vm4387_vm1, %v4386_v15 }
0x13d5   :  { %4110 = vmatprep.subr.mxu0 %v4386_v15  ;;  %4107 = vmatprep.mubr.msk.f32.mxu1 %vm4387_vm1, %v4386_v15 }
0x13d7   :  { %4103 = vmatmul.mubr.msk.f32.vlgmr.msra.gmra.mxu0 %vm173_vm2, %v2341_v38 }
0x13d8   :  { %4112 = vmatprep.mubr.msk.f32.mxu0 %vm4387_vm1, %v4386_v15 }
0x148f   :  { %v4858_v41 = vpop.f32.mrf.mxu1 }
0x1491   :  { %v4089_v43 = vpop.f32.mrf.mxu1 }
0x1493   :  { %v4860_v46 = vpop.f32.mrf.mxu0  ;;  %v2336_v47 = vpop.f32.mrf.mxu1 }
0x1494   :  { %v2418_v48 = vmul.f32 0.35355338, %v2336_v47 }
0x1495   :  { %v4094_v51 = vpop.f32.mrf.mxu0  ;;  %v4099_v52 = vpop.f32.mrf.mxu1 }
0x1496   :  { %v2420_v22 = vadd.f32 %v4865_v53, %v2418_v48 }
0x1497   :  { %v2414_v20 = vpop.f32.mrf.mxu0 }
0x1498   :  { %v2419_v57 = vmul.f32 0.35355338, %v2414_v20  ;;  %v2422_v39 = vsel %vm173_vm2, %v2420_v22, -inf }
0x1499   :  { %2423 = vmax.xlane.f32.xlu1 %v2422_v39  ;;  %v4104_v59 = vpop.f32.mrf.mxu0 }
0x149a   :  { %v2421_v62 = vadd.f32 %v4872_v61, %v2419_v57 }
0x149c   :  { %v2425_v0 = vsel %vm173_vm2, %v2421_v62, -inf }
0x149d   :  { %2426 = vmax.xlane.f32.xlu0 %v2425_v0 }
0x14aa   :  { %2444 = vrot.lane.b32.xlu1 %v4802_v60, %s4392_s21 }
0x14ae   :  { %2598 = vrot.lane.b32.xlu1 %v4802_v60, %s4393_s22 }
0x14b2   :  { %2676 = vrot.lane.b32.xlu1 %v4806_v63, %s4393_s22 }
0x14b6   :  { %2596 = vrot.lane.b32.xlu1 %v4802_v60, %s4394_s23 }
0x1522   :  { %v2424_v1 = vpop.xlane.xlu1 %2423 }
0x1523   :  { %v2428_v25 = vsub.f32 %v2420_v22, %v2424_v1 }
0x1525   :  { %v2430_v3 = vmul.f32 1.442695, %v2428_v25 }
0x1526   :  { %v2445_v5 = vpop.permute.xlu1 %2444  ;;  %v2427_v7 = vpop.xlane.xlu0 %2426 }
0x1527   :  { %4326 = vpow2.f32 %v2430_v3  ;;  %v2429_v9 = vsub.f32 %v2421_v62, %v2427_v7  ;;  %4106 = vmatpush3.msra.mxu1 %v2445_v5 }
0x1528   :  { %4115 = vmatprep.subr.mxu1 %v4386_v15 }
0x1529   :  { %v2432_v36 = vmul.f32 1.442695, %v2429_v9 }
0x152a   :  { %v2599_v4 = vpop.permute.xlu1 %2598 }
0x152b   :  { %4328 = vpow2.f32 %v2432_v36 }
0x152e   :  { %v2677_v14 = vpop.permute.xlu1 %2676 }
0x1532   :  { %v2597_v55 = vpop.permute.xlu1 %2596 }
0x1534   :  { %v4327_v10 = vpop.eup %4326 }
0x1535   :  { %v2434_v11 = vsel %vm173_vm2, %v4327_v10, 0.0 }
0x1536   :  { %2435 = vadd.xlane.f32.xlu0 %v2434_v11 }
0x1538   :  { %v4329_v37 = vpop.eup %4328 }
0x1539   :  { %v2437_v12 = vsel %vm173_vm2, %v4329_v37, 0.0 }
0x153a   :  { %2438 = vadd.xlane.f32.xlu0 %v2437_v12 }
0x1550   :  { %2520 = vrot.lane.b32.xlu0 %v4806_v63, %s4392_s21  ;;  %s4402_s21 = smov [#allocation2]  }
0x1554   :  { %2674 = vrot.lane.b32.xlu0 %v4806_v63, %s4394_s23  ;;  %s5092_s23 = smov 24  }
0x15bf   :  { %v2436_v45 = vpop.xlane.xlu0 %2435 }
0x15c0   :  { %4330 = vrcp.f32 %v2436_v45 }
0x15c3   :  { %v2439_v2 = vpop.xlane.xlu0 %2438 }
0x15c4   :  { %4332 = vrcp.f32 %v2439_v2 }
0x15c7   :  { %v2521_v6 = vpop.permute.xlu0 %2520 }
0x15c8   :  { %4111 = vmatpush3.msra.mxu0 %v2521_v6 }
0x15c9   :  { %4120 = vmatprep.subr.mxu0 %v4386_v15 }
0x15cb   :  { %v2675_v19 = vpop.permute.xlu0 %2674 }
0x15cd   :  { %v4331_v13 = vpop.eup %4330 }
0x15ce   :  { %v2442_v50 = vmul.f32 %v4331_v13, %v4327_v10 }
0x15d0   :  { %4108 = vmatmul.mubr.msk.f32.vlgmr.msra.gmra.mxu1 %vm173_vm2, %v2442_v50 }
0x15d1   :  { %v4333_v17 = vpop.eup %4332  ;;  %4116 = vmatpush3.xpose.msk.msra.mxu1 %vm173_vm2, %v2599_v4  ;;  %4117 = vmatprep.mubr.msk.f32.mxu1 %vm4387_vm1, %v4386_v15 }
0x15d2   :  { %v2443_v18 = vmul.f32 %v4333_v17, %v4329_v37  ;;  %4125 = vmatprep.subr.mxu1 %v4386_v15 }
0x15d4   :  { %4113 = vmatmul.mubr.msk.f32.vlgmr.msra.gmra.mxu0 %vm173_vm2, %v2443_v18  ;;  %4118 = vmatmul.mubr.msk.f32.vlgmr.msra.gmra.mxu1 %vm173_vm2, %v2597_v55 }
0x15d5   :  { %4121 = vmatpush3.xpose.msk.msra.mxu0 %vm173_vm2, %v2677_v14  ;;  %4122 = vmatprep.mubr.msk.f32.mxu0 %vm4387_vm1, %v4386_v15 }
0x15d6   :  { %4130 = vmatprep.subr.mxu0 %v4386_v15  ;;  %4127 = vmatprep.mubr.msk.f32.mxu1 %vm4387_vm1, %v4386_v15 }
0x15d8   :  { %4123 = vmatmul.mubr.msk.f32.vlgmr.msra.gmra.mxu0 %vm173_vm2, %v2675_v19 }
0x15d9   :  { %4132 = vmatprep.mubr.msk.f32.mxu0 %vm4387_vm1, %v4386_v15 }
0x1690   :  { %v4908_v42 = vpop.f32.mrf.mxu1 }
0x1692   :  { %v4109_v23 = vpop.f32.mrf.mxu1 }
0x1694   :  { %v4910_v26 = vpop.f32.mrf.mxu0  ;;  %v2670_v27 = vpop.f32.mrf.mxu1 }
0x1695   :  { %v4231_v28 = vpack.i.bf16 %v4910_v26, %v4908_v42  ;;  %v2752_v29 = vmul.f32 0.35355338, %v2670_v27 }
0x1696   :  { %v4114_v31 = vpop.f32.mrf.mxu0  ;;  %v4119_v32 = vpop.f32.mrf.mxu1 }
0x1697   :  { %v2754_v33 = vadd.f32 %v4865_v53, %v2752_v29 }
0x1698   :  { %v2748_v34 = vpop.f32.mrf.mxu0 }
0x1699   :  { %v2753_v35 = vmul.f32 0.35355338, %v2748_v34  ;;  %v2756_v38 = vsel %vm173_vm2, %v2754_v33, -inf }
0x169a   :  { %2757 = vmax.xlane.f32.xlu1 %v2756_v38  ;;  %v4124_v43 = vpop.f32.mrf.mxu0 }
0x169b   :  { %v2755_v47 = vadd.f32 %v4872_v61, %v2753_v35 }
0x169d   :  { %v2759_v48 = vsel %vm173_vm2, %v2755_v47, -inf }
0x169e   :  { %2760 = vmax.xlane.f32.xlu0 %v2759_v48 }
0x16ab   :  { %2778 = vrot.lane.b32.xlu1 %v4802_v60, %s4395_s24 }
0x16af   :  { %2932 = vrot.lane.b32.xlu1 %v4802_v60, %s4396_s0 }
0x16b3   :  { %3010 = vrot.lane.b32.xlu1 %v4806_v63, %s4396_s0 }
0x16b7   :  { %2930 = vrot.lane.b32.xlu1 %v4802_v60, %s4397_s25 }
0x1723   :  { %v2758_v51 = vpop.xlane.xlu1 %2757 }
0x1724   :  { %v2762_v52 = vsub.f32 %v2754_v33, %v2758_v51 }
0x1726   :  { %v2764_v22 = vmul.f32 1.442695, %v2762_v52 }
0x1727   :  { %v2779_v20 = vpop.permute.xlu1 %2778  ;;  %v2761_v57 = vpop.xlane.xlu0 %2760 }
0x1728   :  { %4334 = vpow2.f32 %v2764_v22  ;;  %v2763_v39 = vsub.f32 %v2755_v47, %v2761_v57  ;;  %4126 = vmatpush3.msra.mxu1 %v2779_v20 }
0x1729   :  { %4135 = vmatprep.subr.mxu1 %v4386_v15 }
0x172a   :  { %v2766_v59 = vmul.f32 1.442695, %v2763_v39 }
0x172b   :  { %v2933_v7 = vpop.permute.xlu1 %2932 }
0x172c   :  { %4336 = vpow2.f32 %v2766_v59  ;;  %v4259_v59 = vld [vmem:[%s5082_s4 + $0x10] sm:$0xff]  }
0x172f   :  { %v3011_v10 = vpop.permute.xlu1 %3010 }
0x1733   :  { %v2931_v45 = vpop.permute.xlu1 %2930 }
0x1735   :  { %v4335_v62 = vpop.eup %4334 }
0x1736   :  { %v2768_v0 = vsel %vm173_vm2, %v4335_v62, 0.0 }
0x1737   :  { %2769 = vadd.xlane.f32.xlu0 %v2768_v0 }
0x1739   :  { %v4337_v1 = vpop.eup %4336 }
0x173a   :  { %v2771_v25 = vsel %vm173_vm2, %v4337_v1, 0.0 }
0x173b   :  { %2772 = vadd.xlane.f32.xlu0 %v2771_v25 }
0x1751   :  { %2854 = vrot.lane.b32.xlu0 %v4806_v63, %s4395_s24 }
0x1755   :  { %3008 = vrot.lane.b32.xlu0 %v4806_v63, %s4397_s25 }
0x17c0   :  { %v2770_v3 = vpop.xlane.xlu0 %2769 }
0x17c1   :  { %4338 = vrcp.f32 %v2770_v3 }
0x17c4   :  { %v2773_v5 = vpop.xlane.xlu0 %2772 }
0x17c5   :  { %4340 = vrcp.f32 %v2773_v5 }
0x17c8   :  { %v2855_v9 = vpop.permute.xlu0 %2854 }
0x17c9   :  { %4131 = vmatpush3.msra.mxu0 %v2855_v9 }
0x17ca   :  { %4140 = vmatprep.subr.mxu0 %v4386_v15 }
0x17cc   :  { %v3009_v2 = vpop.permute.xlu0 %3008 }
0x17ce   :  { %v4339_v36 = vpop.eup %4338 }
0x17cf   :  { %v2776_v11 = vmul.f32 %v4339_v36, %v4335_v62 }
0x17d1   :  { %4128 = vmatmul.mubr.msk.f32.vlgmr.msra.gmra.mxu1 %vm173_vm2, %v2776_v11 }
0x17d2   :  { %v4341_v37 = vpop.eup %4340  ;;  %4136 = vmatpush3.xpose.msk.msra.mxu1 %vm173_vm2, %v2933_v7  ;;  %4137 = vmatprep.mubr.msk.f32.mxu1 %vm4387_vm1, %v4386_v15 }
0x17d3   :  { %v2777_v12 = vmul.f32 %v4341_v37, %v4337_v1  ;;  %4145 = vmatprep.subr.mxu1 %v4386_v15 }
0x17d5   :  { %4133 = vmatmul.mubr.msk.f32.vlgmr.msra.gmra.mxu0 %vm173_vm2, %v2777_v12  ;;  %4138 = vmatmul.mubr.msk.f32.vlgmr.msra.gmra.mxu1 %vm173_vm2, %v2931_v45 }
0x17d6   :  { %4141 = vmatpush3.xpose.msk.msra.mxu0 %vm173_vm2, %v3011_v10  ;;  %4142 = vmatprep.mubr.msk.f32.mxu0 %vm4387_vm1, %v4386_v15 }
0x17d7   :  { %4150 = vmatprep.subr.mxu0 %v4386_v15  ;;  %4147 = vmatprep.mubr.msk.f32.mxu1 %vm4387_vm1, %v4386_v15 }
0x17d9   :  { %4143 = vmatmul.mubr.msk.f32.vlgmr.msra.gmra.mxu0 %vm173_vm2, %v3009_v2 }
0x17da   :  { %4152 = vmatprep.mubr.msk.f32.mxu0 %vm4387_vm1, %v4386_v15 }
0x1891   :  { %v2850_v4 = vpop.f32.mrf.mxu1 }
0x1893   :  { %v4129_v6 = vpop.f32.mrf.mxu1 }
0x1895   :  { %v2926_v13 = vpop.f32.mrf.mxu0  ;;  %v3004_v14 = vpop.f32.mrf.mxu1 }
0x1896   :  { %v3086_v50 = vmul.f32 0.35355338, %v3004_v14 }
0x1897   :  { %v4134_v17 = vpop.f32.mrf.mxu0  ;;  %v4139_v18 = vpop.f32.mrf.mxu1 }
0x1898   :  { %v3088_v55 = vadd.f32 %v4865_v53, %v3086_v50  ;;  %v4236_v53 = vpack.i.bf16 %v2926_v13, %v2850_v4 }
0x1899   :  { %v3082_v19 = vpop.f32.mrf.mxu0 }
0x189a   :  { %v3087_v23 = vmul.f32 0.35355338, %v3082_v19  ;;  %v3090_v27 = vsel %vm173_vm2, %v3088_v55, -inf }
0x189b   :  { %3091 = vmax.xlane.f32.xlu1 %v3090_v27  ;;  %v4144_v29 = vpop.f32.mrf.mxu0 }
0x189c   :  { %v3089_v31 = vadd.f32 %v4872_v61, %v3087_v23 }
0x189e   :  { %v3093_v32 = vsel %vm173_vm2, %v3089_v31, -inf }
0x189f   :  { %3094 = vmax.xlane.f32.xlu0 %v3093_v32 }
0x18ac   :  { %3112 = vrot.lane.b32.xlu1 %v4802_v60, %s4398_s26 }
0x18b0   :  { %4232 = vrot.lane.b32.xlu1 %v4231_v28, %s4399_s27 }
0x18b4   :  { %4237 = vrot.lane.b32.xlu1 %v4236_v53, %s4400_s28 }
0x1924   :  { %v3092_v33 = vpop.xlane.xlu1 %3091 }
0x1925   :  { %v3096_v34 = vsub.f32 %v3088_v55, %v3092_v33 }
0x1927   :  { %v3098_v35 = vmul.f32 1.442695, %v3096_v34 }
0x1928   :  { %v3113_v38 = vpop.permute.xlu1 %3112  ;;  %v3095_v43 = vpop.xlane.xlu0 %3094 }
0x1929   :  { %4342 = vpow2.f32 %v3098_v35  ;;  %v3097_v61 = vsub.f32 %v3089_v31, %v3095_v43  ;;  %4146 = vmatpush3.msra.mxu1 %v3113_v38 }
0x192a   :  { %4155 = vmatprep.subr.bf16.mxu1 %v4386_v15 }
0x192b   :  { %v3100_v47 = vmul.f32 1.442695, %v3097_v61 }
0x192c   :  { %v4233_v5 = vpop.permute.xlu1 %4232 }
0x192d   :  { %4344 = vpow2.f32 %v3100_v47  ;;  %v4235_v9 = vunpack.i.h.bf16 %v4233_v5  ;;  %v4234_v36 = vunpack.i.l.bf16 %v4233_v5 }
0x192f   :  { %v3289_v12 = vsel %vm173_vm2, %v4860_v46, %v4235_v9  ;;  %v3288_v45 = vsel %vm173_vm2, %v4858_v41, %v4234_v36  ;;  %v3298_v46 = vrot.slane %v4798_v58, %v4502_v30  ;;  %v4265_v9 = vld [vmem:[%s5084_s6 + $0x20] sm:$0xff]   ;;  %v3399_v36 = vrot.slane %v4798_v58, %v1653_v40 }
0x1930   :  { %v4238_v7 = vpop.permute.xlu1 %4237 }
0x1931   :  { %v4240_v10 = vunpack.i.h.bf16 %v4238_v7  ;;  %v4239_v11 = vunpack.i.l.bf16 %v4238_v7  ;;  %v4264_v7 = vld [vmem:[%s5084_s6 + $0x28] sm:$0xff]  }
0x1933   :  { %v3291_v6 = vsel %vm1543_vm3, %v3289_v12, %v4240_v10  ;;  %v3290_v13 = vsel %vm1543_vm3, %v3288_v45, %v4239_v11 }
0x1936   :  { %v4343_v60 = vpop.eup %4342 }
0x1937   :  { %v3102_v48 = vsel %vm173_vm2, %v4343_v60, 0.0 }
0x1938   :  { %3103 = vadd.xlane.f32.xlu0 %v3102_v48  ;;  %v4261_v48 = vld [vmem:[%s5083_s5 + $0x10] sm:$0xff]  }
0x193a   :  { %v4345_v42 = vpop.eup %4344 }
0x193b   :  { %v3105_v26 = vsel %vm173_vm2, %v4345_v42, 0.0 }
0x193c   :  { %3106 = vadd.xlane.f32.xlu0 %v3105_v26 }
0x1952   :  { %3188 = vrot.lane.b32.xlu0 %v4806_v63, %s4398_s26  ;;  %v4258_v63 = vld [vmem:[%s5082_s4 + $0x18] sm:$0xff]  }
0x19c1   :  { %v3104_v28 = vpop.xlane.xlu0 %3103 }
0x19c2   :  { %4346 = vrcp.f32 %v3104_v28 }
0x19c5   :  { %v3107_v51 = vpop.xlane.xlu0 %3106 }
0x19c6   :  { %4348 = vrcp.f32 %v3107_v51 }
0x19c9   :  { %v3189_v52 = vpop.permute.xlu0 %3188 }
0x19ca   :  { %4151 = vmatpush3.msra.mxu0 %v3189_v52 }
0x19cb   :  { %4163 = vmatprep.subr.bf16.mxu0 %v4386_v15 }
0x19cf   :  { %v4347_v22 = vpop.eup %4346 }
0x19d0   :  { %v3110_v20 = vmul.f32 %v4347_v22, %v4343_v60 }
0x19d2   :  { %4148 = vmatmul.mubr.msk.f32.vlgmr.msra.gmra.mxu1 %vm173_vm2, %v3110_v20 }
0x19d3   :  { %v4349_v57 = vpop.eup %4348  ;;  %4159 = vmatprep.mubr.msk.bf16.mxu1 %vm4387_vm1, %v4386_v15  ;;  %4156 = vmatpush3.bf16.msra.mxu1 %v4258_v63 }
0x19d4   :  { %v3111_v39 = vmul.f32 %v4349_v57, %v4345_v42  ;;  %4157 = vmatprep.subr.bf16.mxu1 %v4386_v15 }
0x19d6   :  { %4153 = vmatmul.mubr.msk.f32.vlgmr.msra.gmra.mxu0 %vm173_vm2, %v3111_v39  ;;  %v3386_v39 = vrot.slane %v4798_v58, %v1640_v16  ;;  %v4262_v16 = vld [vmem:[%s5084_s6 + $0x38] sm:$0xff]  }
0x19d7   :  { %4167 = vmatprep.mubr.msk.bf16.mxu0 %vm4387_vm1, %v4386_v15  ;;  %4158 = vmatpush3.bf16.msra.mxu1 %v4259_v59 }
0x19d8   :  { %4171 = vmatprep.subr.bf16.mxu1 %v4386_v15 }
0x1a92   :  { %v3184_v62 = vpop.f32.mrf.mxu1 }
0x1a94   :  { %v4149_v0 = vpop.f32.mrf.mxu1 }
0x1a95   :  { %v3392_v0 = vrot.slane %v4798_v58, %v1646_v21  ;;  %v4263_v21 = vld [vmem:[%s5084_s6 + $0x30] sm:$0xff]  }
0x1a96   :  { %v3260_v1 = vpop.f32.mrf.mxu0 }
0x1a97   :  { %v4241_v25 = vpack.i.bf16 %v3260_v1, %v3184_v62 }
0x1a98   :  { %v4154_v3 = vpop.f32.mrf.mxu0 }
0x1a99   :  { %4242 = vrot.lane.b32.xlu1 %v4241_v25, %s5092_s23 }
0x1b0b   :  { %v4243_v37 = vpop.permute.xlu1 %4242 }
0x1b0c   :  { %v4245_v2 = vunpack.i.h.bf16 %v4243_v37  ;;  %v4244_v4 = vunpack.i.l.bf16 %v4243_v37 }
0x1b0e   :  { %v3293_v14 = vsel %vm1546_vm4, %v3291_v6, %v4245_v2  ;;  %v3292_v50 = vsel %vm1546_vm4, %v3290_v13, %v4244_v4 }
0x1b0f   :  { %v3294_v17 = vpack.c.bf16 %v3293_v14, %v3292_v50 }
0x1b11   :  { %4160 = vmatmul.mubr.msk.bf16.vlgmr.msra.gmra.mxu1 %vm46_vm0, %v3294_v17 }
0x1b12   :  { %4179 = vmatprep.mubr.msk.bf16.mxu1 %vm4387_vm1, %v4386_v15  ;;  %4172 = vmatpush3.bf16.msra.mxu1 %v4262_v16  ;;  %v3578_v16 = vrot.slane %v4798_v58, %v1833_v44 }
0x1b13   :  { %4173 = vmatprep.subr.bf16.mxu1 %v4386_v15 }
0x1b16   :  { %4174 = vmatpush3.bf16.msra.mxu1 %v4263_v21 }
0x1b17   :  { %4175 = vmatprep.subr.bf16.mxu1 %v4386_v15 }
0x1b1a   :  { %4176 = vmatpush3.bf16.msra.mxu1 %v4264_v7 }
0x1b1b   :  { %4177 = vmatprep.subr.bf16.mxu1 %v4386_v15 }
0x1b1e   :  { %4178 = vmatpush3.bf16.msra.mxu1 %v4265_v9 }
0x1bd1   :  { %v3348_v41 = vpop.f32.mrf.mxu1 }
0x1bd2   :  { %v3349_v18 = vadd.f32 %v3348_v41, %v3298_v46 }
0x1bd3   :  { %v4161_v55 = vpop.f32.mrf.mxu1 }
0x1bd4   :  { %v3355_v19 = vadd.f32 %v3349_v18, %v4786_v54 }
0x1bd5   :  { %v3351_v23 = vpop.f32.mrf.mxu1 }
0x1bd6   :  { %v3352_v27 = vadd.f32 %v3351_v23, %v3298_v46  ;;  %v3357_v29 = vsel %vm46_vm0, %v3355_v19, 0.0 }
0x1bd7   :  { %3358 = vadd.xlane.f32.xlu0 %v3357_v29  ;;  %v4162_v31 = vpop.f32.mrf.mxu1 }
0x1bd8   :  { %v3356_v32 = vadd.f32 %v3352_v27, %v4788_v56  ;;  %v4260_v56 = vld [vmem:[%s5083_s5 + $0x18] sm:$0xff]  }
0x1bd9   :  { %4164 = vmatpush3.bf16.msra.mxu0 %v4260_v56 }
0x1bda   :  { %v3360_v53 = vsel %vm46_vm0, %v3356_v32, 0.0  ;;  %4165 = vmatprep.subr.bf16.mxu0 %v4386_v15 }
0x1bdb   :  { %3361 = vadd.xlane.f32.xlu1 %v3360_v53 }
0x1bdd   :  { %4166 = vmatpush3.bf16.msra.mxu0 %v4261_v48 }
0x1bde   :  { %4183 = vmatprep.subr.bf16.mxu0 %v4386_v15 }
0x1c60   :  { %v3359_v33 = vpop.xlane.xlu0 %3358 }
0x1c61   :  { %v3363_v34 = vmul.f32 0.03125, %v3359_v33 }
0x1c63   :  { %v3365_v35 = vsub.f32 %v3355_v19, %v3363_v34  ;;  %v3478_v34 = vrot.slane %v4798_v58, %v1732_v8 }
0x1c64   :  { %v3362_v30 = vpop.xlane.xlu1 %3361 }
0x1c65   :  { %v3364_v38 = vmul.f32 0.03125, %v3362_v30  ;;  %v3367_v43 = vmul.f32 %v3365_v35, %v3365_v35 }
0x1c67   :  { %v3366_v61 = vsub.f32 %v3356_v32, %v3364_v38  ;;  %v3369_v54 = vsel %vm46_vm0, %v3367_v43, 0.0 }
0x1c68   :  { %3370 = vadd.xlane.f32.xlu0 %v3369_v54 }
0x1c69   :  { %v3368_v47 = vmul.f32 %v3366_v61, %v3366_v61 }
0x1c6b   :  { %v3372_v60 = vsel %vm46_vm0, %v3368_v47, 0.0 }
0x1c6c   :  { %3373 = vadd.xlane.f32.xlu0 %v3372_v60 }
0x1cf1   :  { %v3371_v42 = vpop.xlane.xlu0 %3370 }
0x1cf2   :  { %v3375_v26 = vmul.f32 0.03125, %v3371_v42 }
0x1cf4   :  { %v3377_v28 = vadd.f32 1e-12, %v3375_v26 }
0x1cf5   :  { %v3374_v51 = vpop.xlane.xlu0 %3373 }
0x1cf6   :  { %4350 = vrsqrt.f32 %v3377_v28  ;;  %v3376_v52 = vmul.f32 0.03125, %v3374_v51 }
0x1cf8   :  { %v3378_v22 = vadd.f32 1e-12, %v3376_v52 }
0x1cfa   :  { %4352 = vrsqrt.f32 %v3378_v22 }
0x1d03   :  { %v4351_v20 = vpop.eup %4350 }
0x1d04   :  { %v3381_v57 = vmul.f32 %v4351_v20, %v3365_v35 }
0x1d06   :  { %v3387_v62 = vmul.f32 %v3386_v39, %v3381_v57 }
0x1d07   :  { %v4353_v63 = vpop.eup %4352 }
0x1d08   :  { %v3382_v59 = vmul.f32 %v4353_v63, %v3366_v61  ;;  %v3393_v25 = vadd.f32 %v3392_v0, %v3387_v62  ;;  %v4266_v63 = vld [vmem:[%s5086_s8 + $0x8] sm:$0xff]  }
0x1d0a   :  { %v3388_v1 = vmul.f32 %v3386_v39, %v3382_v59  ;;  %v4267_v59 = vld [vmem:[%s5086_s8] sm:$0xff]  }
0x1d0c   :  { %v3394_v3 = vadd.f32 %v3392_v0, %v3388_v1 }
0x1d0e   :  { %v3395_v5 = vpack.c.bf16 %v3394_v3, %v3393_v25 }
0x1d10   :  { %4168 = vmatmul.mubr.msk.bf16.vlgmr.msra.gmra.mxu0 %vm46_vm0, %v3395_v5 }
0x1d11   :  { %4187 = vmatprep.mubr.msk.bf16.mxu0 %vm4387_vm1, %v4386_v15  ;;  %4184 = vmatpush3.bf16.msra.mxu0 %v4266_v63 }
0x1d12   :  { %4185 = vmatprep.subr.bf16.mxu0 %v4386_v15 }
0x1d15   :  { %4186 = vmatpush3.bf16.msra.mxu0 %v4267_v59 }
0x1d16   :  { %4191 = vmatprep.subr.bf16.mxu0 %v4386_v15 }
0x1dd0   :  { %v3449_v10 = vpop.f32.mrf.mxu0 }
0x1dd1   :  { %v3450_v11 = vadd.f32 %v3449_v10, %v3399_v36 }
0x1dd2   :  { %v4169_v37 = vpop.f32.mrf.mxu0 }
0x1dd3   :  { %v3456_v12 = vmul.f32 %v3450_v11, %v3450_v11 }
0x1dd4   :  { %v3452_v45 = vpop.f32.mrf.mxu0 }
0x1dd5   :  { %v3458_v2 = vmul.f32 %v3456_v12, %v3450_v11  ;;  %v3453_v4 = vadd.f32 %v3452_v45, %v3399_v36  ;;  %v3584_v36 = vrot.slane %v4798_v58, %v1839_v49  ;;  %v4269_v49 = vld [vmem:[%s5088_s10] sm:$0xff]   ;;  %s3738_s10 = sshll.u32 %s4402_s21, 4  ;;  %s3739_s10 = int_to_ptr.vmem [resolvable:$true] %s3738_s10 }
0x1dd6   :  { %v4170_v6 = vpop.f32.mrf.mxu0  ;;  %v3845_v58 = vld [vmem:[%s5087_s9] ss:$0 sm:$0xff]  ;;  %s4364_s9 = scalar_lea.vmem %s3739_s10, 32  ;;  %p4369_p1 = scmp.lt.s32.totalorder %s3739_s10, %s3739_s10 }
0x1dd7   :  { %v3460_v13 = vmul.f32 0.044715, %v3458_v2  ;;  %v3457_v14 = vmul.f32 %v3453_v4, %v3453_v4  ;;  %p4365_p0 = scmp.ne.s32.totalorder %s3739_s10, %s4364_s9  ;;  %p4370_p2 = scmp.lt.s32.totalorder %s4364_s9, %s4364_s9 }
0x1dd9   :  { %v3462_v50 = vadd.f32 %v3460_v13, %v3450_v11  ;;  %v3459_v17 = vmul.f32 %v3457_v14, %v3453_v4  ;;  %p4371_p3 = por %p4370_p2, %p4369_p1 }
0x1ddb   :  { %v3464_v46 = vmul.f32 0.7978846, %v3462_v50  ;;  %v3461_v41 = vmul.f32 0.044715, %v3459_v17  ;;  %p4372_p4 = pnand %p4371_p3, %p4365_p0 }
0x1ddd   :  { %4354 = vtanh.f32 %v3464_v46  ;;  %v3463_v18 = vadd.f32 %v3461_v41, %v3453_v4 }
0x1ddf   :  { %v3465_v55 = vmul.f32 0.7978846, %v3463_v18 }
0x1de1   :  { %4356 = vtanh.f32 %v3465_v55 }
0x1dea   :  { %v4355_v19 = vpop.eup %4354 }
0x1deb   :  { %v3468_v40 = vadd.f32 1.0, %v4355_v19 }
0x1ded   :  { %v3470_v27 = vmul.f32 0.5, %v3468_v40 }
0x1dee   :  { %v4357_v23 = vpop.eup %4356 }
0x1def   :  { %v3469_v29 = vadd.f32 1.0, %v4357_v23  ;;  %v3472_v32 = vmul.f32 %v3470_v27, %v3450_v11 }
0x1df1   :  { %v3471_v31 = vmul.f32 0.5, %v3469_v29 }
0x1df3   :  { %v3473_v53 = vmul.f32 %v3471_v31, %v3453_v4 }
0x1df5   :  { %v3474_v33 = vpack.c.bf16 %v3473_v53, %v3472_v32 }
0x1df7   :  { %4180 = vmatmul.mubr.msk.bf16.vlgmr.msra.gmra.mxu1 %vm1758_vm5, %v3474_v33 }
0x1eb7   :  { %v3540_v35 = vpop.f32.mrf.mxu1 }
0x1eb8   :  { %v3541_v30 = vadd.f32 %v3540_v35, %v3478_v34 }
0x1eb9   :  { %v4181_v38 = vpop.f32.mrf.mxu1 }
0x1eba   :  { %v3547_v43 = vadd.f32 %v3541_v30, %v3393_v25 }
0x1ebb   :  { %v3543_v61 = vpop.f32.mrf.mxu1 }
0x1ebc   :  { %v3544_v54 = vadd.f32 %v3543_v61, %v3478_v34  ;;  %v3549_v47 = vsel %vm46_vm0, %v3547_v43, 0.0 }
0x1ebd   :  { %3550 = vadd.xlane.f32.xlu1 %v3549_v47  ;;  %v4182_v60 = vpop.f32.mrf.mxu1 }
0x1ebe   :  { %v3548_v56 = vadd.f32 %v3544_v54, %v3394_v3 }
0x1ec0   :  { %v3552_v48 = vsel %vm46_vm0, %v3548_v56, 0.0 }
0x1ec1   :  { %3553 = vadd.xlane.f32.xlu0 %v3552_v48 }
0x1f46   :  { %v3551_v42 = vpop.xlane.xlu1 %3550 }
0x1f47   :  { %v3555_v26 = vmul.f32 0.03125, %v3551_v42 }
0x1f49   :  { %v3557_v28 = vsub.f32 %v3547_v43, %v3555_v26 }
0x1f4a   :  { %v3554_v51 = vpop.xlane.xlu0 %3553 }
0x1f4b   :  { %v3556_v52 = vmul.f32 0.03125, %v3554_v51  ;;  %v3559_v8 = vmul.f32 %v3557_v28, %v3557_v28 }
0x1f4d   :  { %v3558_v22 = vsub.f32 %v3548_v56, %v3556_v52  ;;  %v3561_v20 = vsel %vm46_vm0, %v3559_v8, 0.0 }
0x1f4e   :  { %3562 = vadd.xlane.f32.xlu1 %v3561_v20 }
0x1f4f   :  { %v3560_v57 = vmul.f32 %v3558_v22, %v3558_v22 }
0x1f51   :  { %v3564_v39 = vsel %vm46_vm0, %v3560_v57, 0.0 }
0x1f52   :  { %3565 = vadd.xlane.f32.xlu0 %v3564_v39 }
0x1fd7   :  { %v3563_v62 = vpop.xlane.xlu1 %3562 }
0x1fd8   :  { %v3567_v0 = vmul.f32 0.03125, %v3563_v62 }
0x1fda   :  { %v3569_v1 = vadd.f32 1e-12, %v3567_v0 }
0x1fdb   :  { %v3566_v25 = vpop.xlane.xlu0 %3565 }
0x1fdc   :  { %4358 = vrsqrt.f32 %v3569_v1  ;;  %v3568_v3 = vmul.f32 0.03125, %v3566_v25 }
0x1fde   :  { %v3570_v5 = vadd.f32 1e-12, %v3568_v3 }
0x1fe0   :  { %4360 = vrsqrt.f32 %v3570_v5 }
0x1fe9   :  { %v4359_v21 = vpop.eup %4358 }
0x1fea   :  { %v3573_v7 = vmul.f32 %v4359_v21, %v3557_v28 }
0x1fec   :  { %v3579_v9 = vmul.f32 %v3578_v16, %v3573_v7 }
0x1fed   :  { %v4361_v10 = vpop.eup %4360 }
0x1fee   :  { %v3574_v11 = vmul.f32 %v4361_v10, %v3558_v22  ;;  %v3585_v12 = vadd.f32 %v3584_v36, %v3579_v9 }
0x1ff0   :  { %v3580_v37 = vmul.f32 %v3578_v16, %v3574_v11  ;;  %v3587_v2 = vpack.c.bf16 %v3585_v12, %v3585_v12 }
0x1ff2   :  { %v3586_v45 = vadd.f32 %v3584_v36, %v3580_v37  ;;  %v3602_v13 = vunpack.c.l.b16 %v3587_v2 }
0x1ff4   :  { %v3588_v4 = vpack.c.bf16 %v3586_v45, %v3586_v45 }
0x1ff6   :  { %v3603_v6 = vunpack.c.l.b16 %v3588_v4 }
0x1ff8   :  { %v3604_v14 = vrot.slane %v3603_v6, 7 }
0x1ffa   :  { %v3606_v50 = vsel %vm3605_vm6, %v3604_v14, %v3602_v13 }
0x1ffb   :  { %v3607_v44 = vpack.c.b16 %v3606_v50, %v3606_v50 }
0x1ffd   :  { %4188 = vmatmul.mubr.msk.bf16.vlgmr.msra.gmra.mxu0 %vm46_vm0, %v3607_v44 }
0x1ffe   :  { %4195 = vmatprep.mubr.msk.bf16.mxu0 %vm4387_vm1, %v4386_v15  ;;  %4192 = vmatpush3.bf16.msra.mxu0 %v4268_v24 }
0x1fff   :  { %4193 = vmatprep.subr.bf16.mxu0 %v4386_v15  ;;  %v3849_v15 = vld [vmem:[%s5089_s11] ss:$0 sm:$0xff] }
0x2002   :  { %4194 = vmatpush3.bf16.msra.mxu0 %v4269_v49 }
0x20bd   :  { %v3657_v17 = vpop.f32.mrf.mxu0 }
0x20be   :  { %v3658_v46 = vadd.f32 %v3845_v58, %v3657_v17 }
0x20bf   :  { %v4189_v41 = vpop.f32.mrf.mxu0 }
0x20c0   :  { %v3663_v18 = vmax.f32 %v3658_v46, 0.0 }
0x20c1   :  { %v3660_v55 = vpop.f32.mrf.mxu0 }
0x20c2   :  { %v3664_v19 = vpack.c.bf16 %v3663_v18, %v3663_v18 }
0x20c3   :  { %v4190_v40 = vpop.f32.mrf.mxu0 }
0x20c4   :  { %4196 = vmatmul.mubr.msk.bf16.vlgmr.msra.gmra.mxu0 %vm46_vm0, %v3664_v19 }
0x2184   :  { %v3725_v23 = vpop.f32.mrf.mxu0 }
0x2185   :  { %v3726_v27 = vadd.f32 %v3849_v15, %v3725_v23 }
0x2186   :  { %v4197_v29 = vpop.f32.mrf.mxu0 }
0x2187   :  { %3731 = vst [vmem:[#allocation2] sm:$0x3] %v3726_v27 }
0x2188   :  { %v3728_v31 = vpop.f32.mrf.mxu0 }
0x2189   :  { %4375 = shalt.err (!%p4372_p4)
}
0x218a   :  { %3741 = dma.vmem_to_hbm [thread:$0]  %s3739_s10, 32, %s5090_s12, [#allocation3]   ;;  %v4198_v32 = vpop.f32.mrf.mxu0 }
0x218b   :  { %4384 = dma.done.wait [#allocation3], 32  }
0x218c   :  { %4385 = vsyncadd [#allocation3], 4294967264 }
0x218d   :  { %3745 = vsyncpa [#allocation3], 1 }

</bundles_post_ra>
